<compile_context>
chip_gen: v5e
topology: v5e:2x2
jax: 0.10.0
libtpu: 0.0.40
codegen_flags: <defaults>
</compile_context>

<pallas_src>
import functools

import jax
import jax.numpy as jnp
from jax.experimental import pallas as pl
from jax.experimental.pallas import tpu as pltpu

EPS = 1e-5  # nn.BatchNorm2d default eps


def _is_pow2(n):
    return (n & (n - 1)) == 0


def resblock_kernel(x_ref, w1_ref, w2_ref, g1_ref, b1_ref, g2_ref, b2_ref,
                    out_ref, *, H, W):
    C, M = x_ref.shape
    x = x_ref[...]  # (C, M) f32; M = N*H*W on lanes, channels on sublanes

    # Per-lane (h, w) coordinates from a (1, M) iota; they broadcast over the
    # C sublanes inside jnp.where.  Power-of-two H/W -> shift/AND, no div/mod.
    lane = jax.lax.broadcasted_iota(jnp.int32, (1, M), 1)
    if _is_pow2(W):
        w_idx = lane & (W - 1)
        row_idx = lane >> ((W - 1).bit_length())
    else:
        w_idx = lane % W
        row_idx = lane // W
    h_idx = (row_idx & (H - 1)) if _is_pow2(H) else (row_idx % H)

    def lane_roll(v, shift):
        """jnp.roll-style rotation along lanes (static, normalized shift)."""
        shift = shift % M
        if shift == 0:
            return v
        return pltpu.roll(v, shift, axis=1)

    def tap_mask(dh, dw):
        # Validity mask (1, M) for the (dh, dw) tap of a 3x3 "SAME" conv with
        # zero padding; also zeroes lanes that rolled across image boundaries.
        conds = []
        if dh < 0:
            conds.append(h_idx >= -dh)
        if dh > 0:
            conds.append(h_idx < H - dh)
        if dw < 0:
            conds.append(w_idx >= -dw)
        if dw > 0:
            conds.append(w_idx < W - dw)
        if not conds:
            return None
        m = conds[0]
        for c in conds[1:]:
            m = jnp.logical_and(m, c)
        return m

    def conv3x3(a, w_ref_):
        # Each tap is a static lane rotation of `a` (factored: row roll by
        # -dh*W, then lane roll by -dw), masked at the borders and fed to one
        # tiny (C, C) @ (C, M) MXU matmul; nine partials accumulate in f32
        # registers -- no im2col scratch, no sublane concatenation.
        acc = None
        for kh in range(3):
            dh = kh - 1
            rowv = lane_roll(a, -dh * W)
            for kw in range(3):
                dw = kw - 1
                v = lane_roll(rowv, -dw)
                mask = tap_mask(dh, dw)
                if mask is not None:
                    v = jnp.where(mask, v, 0.0)
                p = jnp.dot(w_ref_[kh * 3 + kw], v,
                            preferred_element_type=jnp.float32)
                acc = p if acc is None else acc + p
        return acc

    def bn_scale_shift(y, g_ref_, b_ref_):
        # Training-mode BatchNorm2d: per-channel batch stats (biased,
        # centered two-pass variance), affine folded into scale/shift.
        mean = jnp.mean(y, axis=1, keepdims=True)            # (C, 1)
        cent = y - mean
        var = jnp.mean(cent * cent, axis=1, keepdims=True)   # (C, 1)
        scale = g_ref_[...] * jax.lax.rsqrt(var + EPS)
        shift = b_ref_[...] - mean * scale
        return scale, shift

    # conv1 -> bn1 -> relu
    y1 = conv3x3(x, w1_ref)
    s1, t1 = bn_scale_shift(y1, g1_ref, b1_ref)
    a1 = jnp.maximum(y1 * s1 + t1, 0.0)

    # conv2 -> bn2 -> +identity -> relu   (lane-dense (C, M) store)
    y2 = conv3x3(a1, w2_ref)
    s2, t2 = bn_scale_shift(y2, g2_ref, b2_ref)
    out_ref[...] = jnp.maximum(y2 * s2 + t2 + x, 0.0)


@jax.jit
def resblock(x, w1, w2, gamma1, beta1, gamma2, beta2):
    """x: NCHW (as in the PyTorch module); w: OIHW; gamma/beta: (C,)."""
    N, C, H, W = x.shape
    M = N * H * W

    # Lane-dense compute layout: channels on sublanes, flattened N*H*W on
    # lanes (M = 512 = 4 * 128 -> full-lane vregs, unmasked stores).
    x_cm = jnp.transpose(x, (1, 0, 2, 3)).reshape(C, M).astype(jnp.float32)

    # OIHW -> (kh, kw, C_out, C_in) -> (9, C_out, C_in): one (C, C) weight
    # block per tap (kh-major, then kw), matching the in-kernel tap order.
    def reshape_w(w):
        return jnp.transpose(w, (2, 3, 0, 1)).reshape(9, C, C).astype(jnp.float32)

    g1 = gamma1.reshape(C, 1).astype(jnp.float32)
    b1 = beta1.reshape(C, 1).astype(jnp.float32)
    g2 = gamma2.reshape(C, 1).astype(jnp.float32)
    b2 = beta2.reshape(C, 1).astype(jnp.float32)

    vmem = pl.BlockSpec(memory_space=pltpu.MemorySpace.VMEM)
    out_cm = pl.pallas_call(
        functools.partial(resblock_kernel, H=H, W=W),
        out_shape=jax.ShapeDtypeStruct((C, M), jnp.float32),
        in_specs=[vmem] * 7,
        out_specs=vmem,
    )(x_cm, reshape_w(w1), reshape_w(w2), g1, b1, g2, b2)

    # Back to the PyTorch NCHW layout (pure layout plumbing on the XLA side).
    return jnp.transpose(out_cm.reshape(C, N, H, W), (1, 0, 2, 3))


def resblock_ref(x, w1, w2, g1, b1, g2, b2):
    """Pure-JAX NCHW reference mirroring the PyTorch forward (training-mode BN)."""
    def conv(a, w):
        return jax.lax.conv_general_dilated(
            a, w, window_strides=(1, 1), padding="SAME",
            dimension_numbers=("NCHW", "OIHW", "NCHW"),
            precision=jax.lax.Precision.HIGHEST)

    def bn(y, g, b):
        mean = jnp.mean(y, axis=(0, 2, 3), keepdims=True)
        var = jnp.mean((y - mean) ** 2, axis=(0, 2, 3), keepdims=True)
        return (y - mean) * jax.lax.rsqrt(var + EPS) * g.reshape(1, -1, 1, 1) \
            + b.reshape(1, -1, 1, 1)

    out = jax.nn.relu(bn(conv(x, w1), g1, b1))
    out = bn(conv(out, w2), g2, b2) + x
    return jax.nn.relu(out)


if __name__ == "__main__":
    N, C, H, W = 2, 4, 16, 16   # ResBlock(channel=4), x: [2, 4, 16, 16] (NCHW)

    key = jax.random.PRNGKey(0)
    kx, kw1, kw2, kg1, kb1, kg2, kb2 = jax.random.split(key, 7)

    x = jax.random.normal(kx, (N, C, H, W), jnp.float32)
    w1 = 0.1 * jax.random.normal(kw1, (C, C, 3, 3), jnp.float32)
    w2 = 0.1 * jax.random.normal(kw2, (C, C, 3, 3), jnp.float32)
    # BN affine params (PyTorch default gamma=1, beta=0; perturb slightly)
    g1 = 1.0 + 0.1 * jax.random.normal(kg1, (C,), jnp.float32)
    b1 = 0.1 * jax.random.normal(kb1, (C,), jnp.float32)
    g2 = 1.0 + 0.1 * jax.random.normal(kg2, (C,), jnp.float32)
    b2 = 0.1 * jax.random.normal(kb2, (C,), jnp.float32)

    out = jax.block_until_ready(resblock(x, w1, w2, g1, b1, g2, b2))
    ref = resblock_ref(x, w1, w2, g1, b1, g2, b2)

    assert out.shape == (N, C, H, W)
    max_err = jnp.max(jnp.abs(out - ref))
    assert jnp.allclose(out, ref, atol=5e-4, rtol=5e-4), \
        f"max abs err = {max_err}"

    print("KERNEL_OK")
</pallas_src>

<mosaic_0001>
module attributes {stable_mosaic.version = 11 : i64} {
  func.func @resblock_kernel(%arg0: memref<4x512xf32, #tpu.memory_space<vmem>>, %arg1: memref<9x4x4xf32, #tpu.memory_space<vmem>>, %arg2: memref<9x4x4xf32, #tpu.memory_space<vmem>>, %arg3: memref<4x1xf32, #tpu.memory_space<vmem>>, %arg4: memref<4x1xf32, #tpu.memory_space<vmem>>, %arg5: memref<4x1xf32, #tpu.memory_space<vmem>>, %arg6: memref<4x1xf32, #tpu.memory_space<vmem>>, %arg7: memref<4x512xf32, #tpu.memory_space<vmem>>) attributes {dimension_semantics = [], scalar_prefetch = 0 : i64, scratch_operands = 0 : i64, tpu.core_type = #tpu.core_type<tc>} {
    %c0 = arith.constant 0 : index
    %c0_0 = arith.constant 0 : index
    %0 = vector.load %arg0[%c0, %c0_0] : memref<4x512xf32, #tpu.memory_space<vmem>>, vector<4x512xf32>
    %1 = tpu.iota {dimensions = array<i32: 1>} : vector<1x512xi32>
    %c15_i32 = arith.constant 15 : i32
    %2 = vector.broadcast %c15_i32 : i32 to vector<1x512xi32>
    %3 = arith.andi %1, %2 : vector<1x512xi32>
    %c4_i32 = arith.constant 4 : i32
    %4 = vector.broadcast %c4_i32 : i32 to vector<1x512xi32>
    %5 = arith.shrsi %1, %4 : vector<1x512xi32>
    %c15_i32_1 = arith.constant 15 : i32
    %6 = vector.broadcast %c15_i32_1 : i32 to vector<1x512xi32>
    %7 = arith.andi %5, %6 : vector<1x512xi32>
    %c16_i32 = arith.constant 16 : i32
    %8 = tpu.dynamic_rotate %0 by %c16_i32 dim 1 : vector<4x512xf32>, i32 -> vector<4x512xf32>
    %c1_i32 = arith.constant 1 : i32
    %9 = tpu.dynamic_rotate %8 by %c1_i32 dim 1 : vector<4x512xf32>, i32 -> vector<4x512xf32>
    %c1_i32_2 = arith.constant 1 : i32
    %10 = vector.broadcast %c1_i32_2 : i32 to vector<1x512xi32>
    %11 = arith.cmpi sge, %7, %10 : vector<1x512xi32>
    %c1_i32_3 = arith.constant 1 : i32
    %12 = vector.broadcast %c1_i32_3 : i32 to vector<1x512xi32>
    %13 = arith.cmpi sge, %3, %12 : vector<1x512xi32>
    %14 = arith.andi %11, %13 : vector<1x512xi1>
    %cst = arith.constant 0.000000e+00 : f32
    %15 = vector.shape_cast %14 : vector<1x512xi1> to vector<1x512xi1>
    %16 = vector.broadcast %15 : vector<1x512xi1> to vector<4x512xi1>
    %17 = vector.broadcast %cst : f32 to vector<4x512xf32>
    %18 = arith.select %16, %9, %17 : vector<4x512xi1>, vector<4x512xf32>
    %c0_4 = arith.constant 0 : index
    %c0_5 = arith.constant 0 : index
    %c0_6 = arith.constant 0 : index
    %19 = vector.load %arg1[%c0_4, %c0_5, %c0_6] : memref<9x4x4xf32, #tpu.memory_space<vmem>>, vector<1x4x4xf32>
    %20 = vector.shape_cast %19 : vector<1x4x4xf32> to vector<4x4xf32>
    %cst_7 = arith.constant dense<0.000000e+00> : vector<4x512xf32>
    %21 = tpu.matmul %20, %18, %cst_7 {dimension_numbers = #tpu.dot_dimension_numbers<[1], [0], [0], [1], [0, 0, 1, 1], [], []>} : vector<4x4xf32>, vector<4x512xf32>, vector<4x512xf32> -> vector<4x512xf32>
    %c1_i32_8 = arith.constant 1 : i32
    %22 = vector.broadcast %c1_i32_8 : i32 to vector<1x512xi32>
    %23 = arith.cmpi sge, %7, %22 : vector<1x512xi32>
    %cst_9 = arith.constant 0.000000e+00 : f32
    %24 = vector.shape_cast %23 : vector<1x512xi1> to vector<1x512xi1>
    %25 = vector.broadcast %24 : vector<1x512xi1> to vector<4x512xi1>
    %26 = vector.broadcast %cst_9 : f32 to vector<4x512xf32>
    %27 = arith.select %25, %8, %26 : vector<4x512xi1>, vector<4x512xf32>
    %c1 = arith.constant 1 : index
    %c0_10 = arith.constant 0 : index
    %c0_11 = arith.constant 0 : index
    %28 = vector.load %arg1[%c1, %c0_10, %c0_11] : memref<9x4x4xf32, #tpu.memory_space<vmem>>, vector<1x4x4xf32>
    %29 = vector.shape_cast %28 : vector<1x4x4xf32> to vector<4x4xf32>
    %cst_12 = arith.constant dense<0.000000e+00> : vector<4x512xf32>
    %30 = tpu.matmul %29, %27, %cst_12 {dimension_numbers = #tpu.dot_dimension_numbers<[1], [0], [0], [1], [0, 0, 1, 1], [], []>} : vector<4x4xf32>, vector<4x512xf32>, vector<4x512xf32> -> vector<4x512xf32>
    %31 = arith.addf %21, %30 : vector<4x512xf32>
    %c511_i32 = arith.constant 511 : i32
    %32 = tpu.dynamic_rotate %8 by %c511_i32 dim 1 : vector<4x512xf32>, i32 -> vector<4x512xf32>
    %c1_i32_13 = arith.constant 1 : i32
    %33 = vector.broadcast %c1_i32_13 : i32 to vector<1x512xi32>
    %34 = arith.cmpi sge, %7, %33 : vector<1x512xi32>
    %c15_i32_14 = arith.constant 15 : i32
    %35 = vector.broadcast %c15_i32_14 : i32 to vector<1x512xi32>
    %36 = arith.cmpi slt, %3, %35 : vector<1x512xi32>
    %37 = arith.andi %34, %36 : vector<1x512xi1>
    %cst_15 = arith.constant 0.000000e+00 : f32
    %38 = vector.shape_cast %37 : vector<1x512xi1> to vector<1x512xi1>
    %39 = vector.broadcast %38 : vector<1x512xi1> to vector<4x512xi1>
    %40 = vector.broadcast %cst_15 : f32 to vector<4x512xf32>
    %41 = arith.select %39, %32, %40 : vector<4x512xi1>, vector<4x512xf32>
    %c2 = arith.constant 2 : index
    %c0_16 = arith.constant 0 : index
    %c0_17 = arith.constant 0 : index
    %42 = vector.load %arg1[%c2, %c0_16, %c0_17] : memref<9x4x4xf32, #tpu.memory_space<vmem>>, vector<1x4x4xf32>
    %43 = vector.shape_cast %42 : vector<1x4x4xf32> to vector<4x4xf32>
    %cst_18 = arith.constant dense<0.000000e+00> : vector<4x512xf32>
    %44 = tpu.matmul %43, %41, %cst_18 {dimension_numbers = #tpu.dot_dimension_numbers<[1], [0], [0], [1], [0, 0, 1, 1], [], []>} : vector<4x4xf32>, vector<4x512xf32>, vector<4x512xf32> -> vector<4x512xf32>
    %45 = arith.addf %31, %44 : vector<4x512xf32>
    %c1_i32_19 = arith.constant 1 : i32
    %46 = tpu.dynamic_rotate %0 by %c1_i32_19 dim 1 : vector<4x512xf32>, i32 -> vector<4x512xf32>
    %c1_i32_20 = arith.constant 1 : i32
    %47 = vector.broadcast %c1_i32_20 : i32 to vector<1x512xi32>
    %48 = arith.cmpi sge, %3, %47 : vector<1x512xi32>
    %cst_21 = arith.constant 0.000000e+00 : f32
    %49 = vector.shape_cast %48 : vector<1x512xi1> to vector<1x512xi1>
    %50 = vector.broadcast %49 : vector<1x512xi1> to vector<4x512xi1>
    %51 = vector.broadcast %cst_21 : f32 to vector<4x512xf32>
    %52 = arith.select %50, %46, %51 : vector<4x512xi1>, vector<4x512xf32>
    %c3 = arith.constant 3 : index
    %c0_22 = arith.constant 0 : index
    %c0_23 = arith.constant 0 : index
    %53 = vector.load %arg1[%c3, %c0_22, %c0_23] : memref<9x4x4xf32, #tpu.memory_space<vmem>>, vector<1x4x4xf32>
    %54 = vector.shape_cast %53 : vector<1x4x4xf32> to vector<4x4xf32>
    %cst_24 = arith.constant dense<0.000000e+00> : vector<4x512xf32>
    %55 = tpu.matmul %54, %52, %cst_24 {dimension_numbers = #tpu.dot_dimension_numbers<[1], [0], [0], [1], [0, 0, 1, 1], [], []>} : vector<4x4xf32>, vector<4x512xf32>, vector<4x512xf32> -> vector<4x512xf32>
    %56 = arith.addf %45, %55 : vector<4x512xf32>
    %c4 = arith.constant 4 : index
    %c0_25 = arith.constant 0 : index
    %c0_26 = arith.constant 0 : index
    %57 = vector.load %arg1[%c4, %c0_25, %c0_26] : memref<9x4x4xf32, #tpu.memory_space<vmem>>, vector<1x4x4xf32>
    %58 = vector.shape_cast %57 : vector<1x4x4xf32> to vector<4x4xf32>
    %cst_27 = arith.constant dense<0.000000e+00> : vector<4x512xf32>
    %59 = tpu.matmul %58, %0, %cst_27 {dimension_numbers = #tpu.dot_dimension_numbers<[1], [0], [0], [1], [0, 0, 1, 1], [], []>} : vector<4x4xf32>, vector<4x512xf32>, vector<4x512xf32> -> vector<4x512xf32>
    %60 = arith.addf %56, %59 : vector<4x512xf32>
    %c511_i32_28 = arith.constant 511 : i32
    %61 = tpu.dynamic_rotate %0 by %c511_i32_28 dim 1 : vector<4x512xf32>, i32 -> vector<4x512xf32>
    %c15_i32_29 = arith.constant 15 : i32
    %62 = vector.broadcast %c15_i32_29 : i32 to vector<1x512xi32>
    %63 = arith.cmpi slt, %3, %62 : vector<1x512xi32>
    %cst_30 = arith.constant 0.000000e+00 : f32
    %64 = vector.shape_cast %63 : vector<1x512xi1> to vector<1x512xi1>
    %65 = vector.broadcast %64 : vector<1x512xi1> to vector<4x512xi1>
    %66 = vector.broadcast %cst_30 : f32 to vector<4x512xf32>
    %67 = arith.select %65, %61, %66 : vector<4x512xi1>, vector<4x512xf32>
    %c5 = arith.constant 5 : index
    %c0_31 = arith.constant 0 : index
    %c0_32 = arith.constant 0 : index
    %68 = vector.load %arg1[%c5, %c0_31, %c0_32] : memref<9x4x4xf32, #tpu.memory_space<vmem>>, vector<1x4x4xf32>
    %69 = vector.shape_cast %68 : vector<1x4x4xf32> to vector<4x4xf32>
    %cst_33 = arith.constant dense<0.000000e+00> : vector<4x512xf32>
    %70 = tpu.matmul %69, %67, %cst_33 {dimension_numbers = #tpu.dot_dimension_numbers<[1], [0], [0], [1], [0, 0, 1, 1], [], []>} : vector<4x4xf32>, vector<4x512xf32>, vector<4x512xf32> -> vector<4x512xf32>
    %71 = arith.addf %60, %70 : vector<4x512xf32>
    %c496_i32 = arith.constant 496 : i32
    %72 = tpu.dynamic_rotate %0 by %c496_i32 dim 1 : vector<4x512xf32>, i32 -> vector<4x512xf32>
    %c1_i32_34 = arith.constant 1 : i32
    %73 = tpu.dynamic_rotate %72 by %c1_i32_34 dim 1 : vector<4x512xf32>, i32 -> vector<4x512xf32>
    %c15_i32_35 = arith.constant 15 : i32
    %74 = vector.broadcast %c15_i32_35 : i32 to vector<1x512xi32>
    %75 = arith.cmpi slt, %7, %74 : vector<1x512xi32>
    %c1_i32_36 = arith.constant 1 : i32
    %76 = vector.broadcast %c1_i32_36 : i32 to vector<1x512xi32>
    %77 = arith.cmpi sge, %3, %76 : vector<1x512xi32>
    %78 = arith.andi %75, %77 : vector<1x512xi1>
    %cst_37 = arith.constant 0.000000e+00 : f32
    %79 = vector.shape_cast %78 : vector<1x512xi1> to vector<1x512xi1>
    %80 = vector.broadcast %79 : vector<1x512xi1> to vector<4x512xi1>
    %81 = vector.broadcast %cst_37 : f32 to vector<4x512xf32>
    %82 = arith.select %80, %73, %81 : vector<4x512xi1>, vector<4x512xf32>
    %c6 = arith.constant 6 : index
    %c0_38 = arith.constant 0 : index
    %c0_39 = arith.constant 0 : index
    %83 = vector.load %arg1[%c6, %c0_38, %c0_39] : memref<9x4x4xf32, #tpu.memory_space<vmem>>, vector<1x4x4xf32>
    %84 = vector.shape_cast %83 : vector<1x4x4xf32> to vector<4x4xf32>
    %cst_40 = arith.constant dense<0.000000e+00> : vector<4x512xf32>
    %85 = tpu.matmul %84, %82, %cst_40 {dimension_numbers = #tpu.dot_dimension_numbers<[1], [0], [0], [1], [0, 0, 1, 1], [], []>} : vector<4x4xf32>, vector<4x512xf32>, vector<4x512xf32> -> vector<4x512xf32>
    %86 = arith.addf %71, %85 : vector<4x512xf32>
    %c15_i32_41 = arith.constant 15 : i32
    %87 = vector.broadcast %c15_i32_41 : i32 to vector<1x512xi32>
    %88 = arith.cmpi slt, %7, %87 : vector<1x512xi32>
    %cst_42 = arith.constant 0.000000e+00 : f32
    %89 = vector.shape_cast %88 : vector<1x512xi1> to vector<1x512xi1>
    %90 = vector.broadcast %89 : vector<1x512xi1> to vector<4x512xi1>
    %91 = vector.broadcast %cst_42 : f32 to vector<4x512xf32>
    %92 = arith.select %90, %72, %91 : vector<4x512xi1>, vector<4x512xf32>
    %c7 = arith.constant 7 : index
    %c0_43 = arith.constant 0 : index
    %c0_44 = arith.constant 0 : index
    %93 = vector.load %arg1[%c7, %c0_43, %c0_44] : memref<9x4x4xf32, #tpu.memory_space<vmem>>, vector<1x4x4xf32>
    %94 = vector.shape_cast %93 : vector<1x4x4xf32> to vector<4x4xf32>
    %cst_45 = arith.constant dense<0.000000e+00> : vector<4x512xf32>
    %95 = tpu.matmul %94, %92, %cst_45 {dimension_numbers = #tpu.dot_dimension_numbers<[1], [0], [0], [1], [0, 0, 1, 1], [], []>} : vector<4x4xf32>, vector<4x512xf32>, vector<4x512xf32> -> vector<4x512xf32>
    %96 = arith.addf %86, %95 : vector<4x512xf32>
    %c511_i32_46 = arith.constant 511 : i32
    %97 = tpu.dynamic_rotate %72 by %c511_i32_46 dim 1 : vector<4x512xf32>, i32 -> vector<4x512xf32>
    %c15_i32_47 = arith.constant 15 : i32
    %98 = vector.broadcast %c15_i32_47 : i32 to vector<1x512xi32>
    %99 = arith.cmpi slt, %7, %98 : vector<1x512xi32>
    %c15_i32_48 = arith.constant 15 : i32
    %100 = vector.broadcast %c15_i32_48 : i32 to vector<1x512xi32>
    %101 = arith.cmpi slt, %3, %100 : vector<1x512xi32>
    %102 = arith.andi %99, %101 : vector<1x512xi1>
    %cst_49 = arith.constant 0.000000e+00 : f32
    %103 = vector.shape_cast %102 : vector<1x512xi1> to vector<1x512xi1>
    %104 = vector.broadcast %103 : vector<1x512xi1> to vector<4x512xi1>
    %105 = vector.broadcast %cst_49 : f32 to vector<4x512xf32>
    %106 = arith.select %104, %97, %105 : vector<4x512xi1>, vector<4x512xf32>
    %c8 = arith.constant 8 : index
    %c0_50 = arith.constant 0 : index
    %c0_51 = arith.constant 0 : index
    %107 = vector.load %arg1[%c8, %c0_50, %c0_51] : memref<9x4x4xf32, #tpu.memory_space<vmem>>, vector<1x4x4xf32>
    %108 = vector.shape_cast %107 : vector<1x4x4xf32> to vector<4x4xf32>
    %cst_52 = arith.constant dense<0.000000e+00> : vector<4x512xf32>
    %109 = tpu.matmul %108, %106, %cst_52 {dimension_numbers = #tpu.dot_dimension_numbers<[1], [0], [0], [1], [0, 0, 1, 1], [], []>} : vector<4x4xf32>, vector<4x512xf32>, vector<4x512xf32> -> vector<4x512xf32>
    %110 = arith.addf %96, %109 : vector<4x512xf32>
    %cst_53 = arith.constant dense<0.000000e+00> : vector<4xf32>
    %111 = vector.multi_reduction <add>, %110, %cst_53 [1] : vector<4x512xf32> to vector<4xf32>
    %112 = vector.shape_cast %111 : vector<4xf32> to vector<4x1xf32>
    %cst_54 = arith.constant 5.120000e+02 : f32
    %113 = vector.broadcast %cst_54 : f32 to vector<4x1xf32>
    %114 = arith.divf %112, %113 : vector<4x1xf32>
    %115 = vector.broadcast %114 : vector<4x1xf32> to vector<4x512xf32>
    %116 = arith.subf %110, %115 : vector<4x512xf32>
    %117 = arith.mulf %116, %116 : vector<4x512xf32>
    %cst_55 = arith.constant dense<0.000000e+00> : vector<4xf32>
    %118 = vector.multi_reduction <add>, %117, %cst_55 [1] : vector<4x512xf32> to vector<4xf32>
    %119 = vector.shape_cast %118 : vector<4xf32> to vector<4x1xf32>
    %cst_56 = arith.constant 5.120000e+02 : f32
    %120 = vector.broadcast %cst_56 : f32 to vector<4x1xf32>
    %121 = arith.divf %119, %120 : vector<4x1xf32>
    %c0_57 = arith.constant 0 : index
    %c0_58 = arith.constant 0 : index
    %122 = vector.load %arg3[%c0_57, %c0_58] : memref<4x1xf32, #tpu.memory_space<vmem>>, vector<4x1xf32>
    %cst_59 = arith.constant 9.99999974E-6 : f32
    %123 = vector.broadcast %cst_59 : f32 to vector<4x1xf32>
    %124 = arith.addf %121, %123 : vector<4x1xf32>
    %125 = math.rsqrt %124 : vector<4x1xf32>
    %126 = arith.mulf %122, %125 : vector<4x1xf32>
    %c0_60 = arith.constant 0 : index
    %c0_61 = arith.constant 0 : index
    %127 = vector.load %arg4[%c0_60, %c0_61] : memref<4x1xf32, #tpu.memory_space<vmem>>, vector<4x1xf32>
    %128 = arith.mulf %114, %126 : vector<4x1xf32>
    %129 = arith.subf %127, %128 : vector<4x1xf32>
    %130 = vector.broadcast %126 : vector<4x1xf32> to vector<4x512xf32>
    %131 = arith.mulf %110, %130 : vector<4x512xf32>
    %132 = vector.broadcast %129 : vector<4x1xf32> to vector<4x512xf32>
    %133 = arith.addf %131, %132 : vector<4x512xf32>
    %cst_62 = arith.constant 0.000000e+00 : f32
    %134 = vector.broadcast %cst_62 : f32 to vector<4x512xf32>
    %135 = arith.maximumf %133, %134 : vector<4x512xf32>
    %c16_i32_63 = arith.constant 16 : i32
    %136 = tpu.dynamic_rotate %135 by %c16_i32_63 dim 1 : vector<4x512xf32>, i32 -> vector<4x512xf32>
    %c1_i32_64 = arith.constant 1 : i32
    %137 = tpu.dynamic_rotate %136 by %c1_i32_64 dim 1 : vector<4x512xf32>, i32 -> vector<4x512xf32>
    %c1_i32_65 = arith.constant 1 : i32
    %138 = vector.broadcast %c1_i32_65 : i32 to vector<1x512xi32>
    %139 = arith.cmpi sge, %7, %138 : vector<1x512xi32>
    %c1_i32_66 = arith.constant 1 : i32
    %140 = vector.broadcast %c1_i32_66 : i32 to vector<1x512xi32>
    %141 = arith.cmpi sge, %3, %140 : vector<1x512xi32>
    %142 = arith.andi %139, %141 : vector<1x512xi1>
    %cst_67 = arith.constant 0.000000e+00 : f32
    %143 = vector.shape_cast %142 : vector<1x512xi1> to vector<1x512xi1>
    %144 = vector.broadcast %143 : vector<1x512xi1> to vector<4x512xi1>
    %145 = vector.broadcast %cst_67 : f32 to vector<4x512xf32>
    %146 = arith.select %144, %137, %145 : vector<4x512xi1>, vector<4x512xf32>
    %c0_68 = arith.constant 0 : index
    %c0_69 = arith.constant 0 : index
    %c0_70 = arith.constant 0 : index
    %147 = vector.load %arg2[%c0_68, %c0_69, %c0_70] : memref<9x4x4xf32, #tpu.memory_space<vmem>>, vector<1x4x4xf32>
    %148 = vector.shape_cast %147 : vector<1x4x4xf32> to vector<4x4xf32>
    %cst_71 = arith.constant dense<0.000000e+00> : vector<4x512xf32>
    %149 = tpu.matmul %148, %146, %cst_71 {dimension_numbers = #tpu.dot_dimension_numbers<[1], [0], [0], [1], [0, 0, 1, 1], [], []>} : vector<4x4xf32>, vector<4x512xf32>, vector<4x512xf32> -> vector<4x512xf32>
    %c1_i32_72 = arith.constant 1 : i32
    %150 = vector.broadcast %c1_i32_72 : i32 to vector<1x512xi32>
    %151 = arith.cmpi sge, %7, %150 : vector<1x512xi32>
    %cst_73 = arith.constant 0.000000e+00 : f32
    %152 = vector.shape_cast %151 : vector<1x512xi1> to vector<1x512xi1>
    %153 = vector.broadcast %152 : vector<1x512xi1> to vector<4x512xi1>
    %154 = vector.broadcast %cst_73 : f32 to vector<4x512xf32>
    %155 = arith.select %153, %136, %154 : vector<4x512xi1>, vector<4x512xf32>
    %c1_74 = arith.constant 1 : index
    %c0_75 = arith.constant 0 : index
    %c0_76 = arith.constant 0 : index
    %156 = vector.load %arg2[%c1_74, %c0_75, %c0_76] : memref<9x4x4xf32, #tpu.memory_space<vmem>>, vector<1x4x4xf32>
    %157 = vector.shape_cast %156 : vector<1x4x4xf32> to vector<4x4xf32>
    %cst_77 = arith.constant dense<0.000000e+00> : vector<4x512xf32>
    %158 = tpu.matmul %157, %155, %cst_77 {dimension_numbers = #tpu.dot_dimension_numbers<[1], [0], [0], [1], [0, 0, 1, 1], [], []>} : vector<4x4xf32>, vector<4x512xf32>, vector<4x512xf32> -> vector<4x512xf32>
    %159 = arith.addf %149, %158 : vector<4x512xf32>
    %c511_i32_78 = arith.constant 511 : i32
    %160 = tpu.dynamic_rotate %136 by %c511_i32_78 dim 1 : vector<4x512xf32>, i32 -> vector<4x512xf32>
    %c1_i32_79 = arith.constant 1 : i32
    %161 = vector.broadcast %c1_i32_79 : i32 to vector<1x512xi32>
    %162 = arith.cmpi sge, %7, %161 : vector<1x512xi32>
    %c15_i32_80 = arith.constant 15 : i32
    %163 = vector.broadcast %c15_i32_80 : i32 to vector<1x512xi32>
    %164 = arith.cmpi slt, %3, %163 : vector<1x512xi32>
    %165 = arith.andi %162, %164 : vector<1x512xi1>
    %cst_81 = arith.constant 0.000000e+00 : f32
    %166 = vector.shape_cast %165 : vector<1x512xi1> to vector<1x512xi1>
    %167 = vector.broadcast %166 : vector<1x512xi1> to vector<4x512xi1>
    %168 = vector.broadcast %cst_81 : f32 to vector<4x512xf32>
    %169 = arith.select %167, %160, %168 : vector<4x512xi1>, vector<4x512xf32>
    %c2_82 = arith.constant 2 : index
    %c0_83 = arith.constant 0 : index
    %c0_84 = arith.constant 0 : index
    %170 = vector.load %arg2[%c2_82, %c0_83, %c0_84] : memref<9x4x4xf32, #tpu.memory_space<vmem>>, vector<1x4x4xf32>
    %171 = vector.shape_cast %170 : vector<1x4x4xf32> to vector<4x4xf32>
    %cst_85 = arith.constant dense<0.000000e+00> : vector<4x512xf32>
    %172 = tpu.matmul %171, %169, %cst_85 {dimension_numbers = #tpu.dot_dimension_numbers<[1], [0], [0], [1], [0, 0, 1, 1], [], []>} : vector<4x4xf32>, vector<4x512xf32>, vector<4x512xf32> -> vector<4x512xf32>
    %173 = arith.addf %159, %172 : vector<4x512xf32>
    %c1_i32_86 = arith.constant 1 : i32
    %174 = tpu.dynamic_rotate %135 by %c1_i32_86 dim 1 : vector<4x512xf32>, i32 -> vector<4x512xf32>
    %c1_i32_87 = arith.constant 1 : i32
    %175 = vector.broadcast %c1_i32_87 : i32 to vector<1x512xi32>
    %176 = arith.cmpi sge, %3, %175 : vector<1x512xi32>
    %cst_88 = arith.constant 0.000000e+00 : f32
    %177 = vector.shape_cast %176 : vector<1x512xi1> to vector<1x512xi1>
    %178 = vector.broadcast %177 : vector<1x512xi1> to vector<4x512xi1>
    %179 = vector.broadcast %cst_88 : f32 to vector<4x512xf32>
    %180 = arith.select %178, %174, %179 : vector<4x512xi1>, vector<4x512xf32>
    %c3_89 = arith.constant 3 : index
    %c0_90 = arith.constant 0 : index
    %c0_91 = arith.constant 0 : index
    %181 = vector.load %arg2[%c3_89, %c0_90, %c0_91] : memref<9x4x4xf32, #tpu.memory_space<vmem>>, vector<1x4x4xf32>
    %182 = vector.shape_cast %181 : vector<1x4x4xf32> to vector<4x4xf32>
    %cst_92 = arith.constant dense<0.000000e+00> : vector<4x512xf32>
    %183 = tpu.matmul %182, %180, %cst_92 {dimension_numbers = #tpu.dot_dimension_numbers<[1], [0], [0], [1], [0, 0, 1, 1], [], []>} : vector<4x4xf32>, vector<4x512xf32>, vector<4x512xf32> -> vector<4x512xf32>
    %184 = arith.addf %173, %183 : vector<4x512xf32>
    %c4_93 = arith.constant 4 : index
    %c0_94 = arith.constant 0 : index
    %c0_95 = arith.constant 0 : index
    %185 = vector.load %arg2[%c4_93, %c0_94, %c0_95] : memref<9x4x4xf32, #tpu.memory_space<vmem>>, vector<1x4x4xf32>
    %186 = vector.shape_cast %185 : vector<1x4x4xf32> to vector<4x4xf32>
    %cst_96 = arith.constant dense<0.000000e+00> : vector<4x512xf32>
    %187 = tpu.matmul %186, %135, %cst_96 {dimension_numbers = #tpu.dot_dimension_numbers<[1], [0], [0], [1], [0, 0, 1, 1], [], []>} : vector<4x4xf32>, vector<4x512xf32>, vector<4x512xf32> -> vector<4x512xf32>
    %188 = arith.addf %184, %187 : vector<4x512xf32>
    %c511_i32_97 = arith.constant 511 : i32
    %189 = tpu.dynamic_rotate %135 by %c511_i32_97 dim 1 : vector<4x512xf32>, i32 -> vector<4x512xf32>
    %c15_i32_98 = arith.constant 15 : i32
    %190 = vector.broadcast %c15_i32_98 : i32 to vector<1x512xi32>
    %191 = arith.cmpi slt, %3, %190 : vector<1x512xi32>
    %cst_99 = arith.constant 0.000000e+00 : f32
    %192 = vector.shape_cast %191 : vector<1x512xi1> to vector<1x512xi1>
    %193 = vector.broadcast %192 : vector<1x512xi1> to vector<4x512xi1>
    %194 = vector.broadcast %cst_99 : f32 to vector<4x512xf32>
    %195 = arith.select %193, %189, %194 : vector<4x512xi1>, vector<4x512xf32>
    %c5_100 = arith.constant 5 : index
    %c0_101 = arith.constant 0 : index
    %c0_102 = arith.constant 0 : index
    %196 = vector.load %arg2[%c5_100, %c0_101, %c0_102] : memref<9x4x4xf32, #tpu.memory_space<vmem>>, vector<1x4x4xf32>
    %197 = vector.shape_cast %196 : vector<1x4x4xf32> to vector<4x4xf32>
    %cst_103 = arith.constant dense<0.000000e+00> : vector<4x512xf32>
    %198 = tpu.matmul %197, %195, %cst_103 {dimension_numbers = #tpu.dot_dimension_numbers<[1], [0], [0], [1], [0, 0, 1, 1], [], []>} : vector<4x4xf32>, vector<4x512xf32>, vector<4x512xf32> -> vector<4x512xf32>
    %199 = arith.addf %188, %198 : vector<4x512xf32>
    %c496_i32_104 = arith.constant 496 : i32
    %200 = tpu.dynamic_rotate %135 by %c496_i32_104 dim 1 : vector<4x512xf32>, i32 -> vector<4x512xf32>
    %c1_i32_105 = arith.constant 1 : i32
    %201 = tpu.dynamic_rotate %200 by %c1_i32_105 dim 1 : vector<4x512xf32>, i32 -> vector<4x512xf32>
    %c15_i32_106 = arith.constant 15 : i32
    %202 = vector.broadcast %c15_i32_106 : i32 to vector<1x512xi32>
    %203 = arith.cmpi slt, %7, %202 : vector<1x512xi32>
    %c1_i32_107 = arith.constant 1 : i32
    %204 = vector.broadcast %c1_i32_107 : i32 to vector<1x512xi32>
    %205 = arith.cmpi sge, %3, %204 : vector<1x512xi32>
    %206 = arith.andi %203, %205 : vector<1x512xi1>
    %cst_108 = arith.constant 0.000000e+00 : f32
    %207 = vector.shape_cast %206 : vector<1x512xi1> to vector<1x512xi1>
    %208 = vector.broadcast %207 : vector<1x512xi1> to vector<4x512xi1>
    %209 = vector.broadcast %cst_108 : f32 to vector<4x512xf32>
    %210 = arith.select %208, %201, %209 : vector<4x512xi1>, vector<4x512xf32>
    %c6_109 = arith.constant 6 : index
    %c0_110 = arith.constant 0 : index
    %c0_111 = arith.constant 0 : index
    %211 = vector.load %arg2[%c6_109, %c0_110, %c0_111] : memref<9x4x4xf32, #tpu.memory_space<vmem>>, vector<1x4x4xf32>
    %212 = vector.shape_cast %211 : vector<1x4x4xf32> to vector<4x4xf32>
    %cst_112 = arith.constant dense<0.000000e+00> : vector<4x512xf32>
    %213 = tpu.matmul %212, %210, %cst_112 {dimension_numbers = #tpu.dot_dimension_numbers<[1], [0], [0], [1], [0, 0, 1, 1], [], []>} : vector<4x4xf32>, vector<4x512xf32>, vector<4x512xf32> -> vector<4x512xf32>
    %214 = arith.addf %199, %213 : vector<4x512xf32>
    %c15_i32_113 = arith.constant 15 : i32
    %215 = vector.broadcast %c15_i32_113 : i32 to vector<1x512xi32>
    %216 = arith.cmpi slt, %7, %215 : vector<1x512xi32>
    %cst_114 = arith.constant 0.000000e+00 : f32
    %217 = vector.shape_cast %216 : vector<1x512xi1> to vector<1x512xi1>
    %218 = vector.broadcast %217 : vector<1x512xi1> to vector<4x512xi1>
    %219 = vector.broadcast %cst_114 : f32 to vector<4x512xf32>
    %220 = arith.select %218, %200, %219 : vector<4x512xi1>, vector<4x512xf32>
    %c7_115 = arith.constant 7 : index
    %c0_116 = arith.constant 0 : index
    %c0_117 = arith.constant 0 : index
    %221 = vector.load %arg2[%c7_115, %c0_116, %c0_117] : memref<9x4x4xf32, #tpu.memory_space<vmem>>, vector<1x4x4xf32>
    %222 = vector.shape_cast %221 : vector<1x4x4xf32> to vector<4x4xf32>
    %cst_118 = arith.constant dense<0.000000e+00> : vector<4x512xf32>
    %223 = tpu.matmul %222, %220, %cst_118 {dimension_numbers = #tpu.dot_dimension_numbers<[1], [0], [0], [1], [0, 0, 1, 1], [], []>} : vector<4x4xf32>, vector<4x512xf32>, vector<4x512xf32> -> vector<4x512xf32>
    %224 = arith.addf %214, %223 : vector<4x512xf32>
    %c511_i32_119 = arith.constant 511 : i32
    %225 = tpu.dynamic_rotate %200 by %c511_i32_119 dim 1 : vector<4x512xf32>, i32 -> vector<4x512xf32>
    %c15_i32_120 = arith.constant 15 : i32
    %226 = vector.broadcast %c15_i32_120 : i32 to vector<1x512xi32>
    %227 = arith.cmpi slt, %7, %226 : vector<1x512xi32>
    %c15_i32_121 = arith.constant 15 : i32
    %228 = vector.broadcast %c15_i32_121 : i32 to vector<1x512xi32>
    %229 = arith.cmpi slt, %3, %228 : vector<1x512xi32>
    %230 = arith.andi %227, %229 : vector<1x512xi1>
    %cst_122 = arith.constant 0.000000e+00 : f32
    %231 = vector.shape_cast %230 : vector<1x512xi1> to vector<1x512xi1>
    %232 = vector.broadcast %231 : vector<1x512xi1> to vector<4x512xi1>
    %233 = vector.broadcast %cst_122 : f32 to vector<4x512xf32>
    %234 = arith.select %232, %225, %233 : vector<4x512xi1>, vector<4x512xf32>
    %c8_123 = arith.constant 8 : index
    %c0_124 = arith.constant 0 : index
    %c0_125 = arith.constant 0 : index
    %235 = vector.load %arg2[%c8_123, %c0_124, %c0_125] : memref<9x4x4xf32, #tpu.memory_space<vmem>>, vector<1x4x4xf32>
    %236 = vector.shape_cast %235 : vector<1x4x4xf32> to vector<4x4xf32>
    %cst_126 = arith.constant dense<0.000000e+00> : vector<4x512xf32>
    %237 = tpu.matmul %236, %234, %cst_126 {dimension_numbers = #tpu.dot_dimension_numbers<[1], [0], [0], [1], [0, 0, 1, 1], [], []>} : vector<4x4xf32>, vector<4x512xf32>, vector<4x512xf32> -> vector<4x512xf32>
    %238 = arith.addf %224, %237 : vector<4x512xf32>
    %cst_127 = arith.constant dense<0.000000e+00> : vector<4xf32>
    %239 = vector.multi_reduction <add>, %238, %cst_127 [1] : vector<4x512xf32> to vector<4xf32>
    %240 = vector.shape_cast %239 : vector<4xf32> to vector<4x1xf32>
    %cst_128 = arith.constant 5.120000e+02 : f32
    %241 = vector.broadcast %cst_128 : f32 to vector<4x1xf32>
    %242 = arith.divf %240, %241 : vector<4x1xf32>
    %243 = vector.broadcast %242 : vector<4x1xf32> to vector<4x512xf32>
    %244 = arith.subf %238, %243 : vector<4x512xf32>
    %245 = arith.mulf %244, %244 : vector<4x512xf32>
    %cst_129 = arith.constant dense<0.000000e+00> : vector<4xf32>
    %246 = vector.multi_reduction <add>, %245, %cst_129 [1] : vector<4x512xf32> to vector<4xf32>
    %247 = vector.shape_cast %246 : vector<4xf32> to vector<4x1xf32>
    %cst_130 = arith.constant 5.120000e+02 : f32
    %248 = vector.broadcast %cst_130 : f32 to vector<4x1xf32>
    %249 = arith.divf %247, %248 : vector<4x1xf32>
    %c0_131 = arith.constant 0 : index
    %c0_132 = arith.constant 0 : index
    %250 = vector.load %arg5[%c0_131, %c0_132] : memref<4x1xf32, #tpu.memory_space<vmem>>, vector<4x1xf32>
    %cst_133 = arith.constant 9.99999974E-6 : f32
    %251 = vector.broadcast %cst_133 : f32 to vector<4x1xf32>
    %252 = arith.addf %249, %251 : vector<4x1xf32>
    %253 = math.rsqrt %252 : vector<4x1xf32>
    %254 = arith.mulf %250, %253 : vector<4x1xf32>
    %c0_134 = arith.constant 0 : index
    %c0_135 = arith.constant 0 : index
    %255 = vector.load %arg6[%c0_134, %c0_135] : memref<4x1xf32, #tpu.memory_space<vmem>>, vector<4x1xf32>
    %256 = arith.mulf %242, %254 : vector<4x1xf32>
    %257 = arith.subf %255, %256 : vector<4x1xf32>
    %258 = vector.broadcast %254 : vector<4x1xf32> to vector<4x512xf32>
    %259 = arith.mulf %238, %258 : vector<4x512xf32>
    %260 = vector.broadcast %257 : vector<4x1xf32> to vector<4x512xf32>
    %261 = arith.addf %259, %260 : vector<4x512xf32>
    %262 = arith.addf %261, %0 : vector<4x512xf32>
    %cst_136 = arith.constant 0.000000e+00 : f32
    %263 = vector.broadcast %cst_136 : f32 to vector<4x512xf32>
    %264 = arith.maximumf %262, %263 : vector<4x512xf32>
    %c0_137 = arith.constant 0 : index
    %c0_138 = arith.constant 0 : index
    %265 = vector.load %arg7[%c0_137, %c0_138] : memref<4x512xf32, #tpu.memory_space<vmem>>, vector<4x512xf32>
    tpu.vector_store %arg7[%c0_137, %c0_138], %264 {strides = array<i32>} : memref<4x512xf32, #tpu.memory_space<vmem>>, vector<4x512xf32>,
    return
  }
}

</mosaic_0001>

<bundles_post_ra>
// kernel: resblock.1
= control target key start
LH: loop header
LB: loop body
LE: loop exit
PB: predicated region body
PF: predicated region fallthrough
CT: control target
= control target key end

     0   :  { %s2596_s28 = smov 16   ;;  %v28_v22 = vlaneseq  ;;  %vm127_vm3 = vcmask 1043456   ;;  %s2598_s29 = smov 1   ;;  %vm3538_vm7 = vcmask 31744   ;;  %v3572_v58 = vmov 0  ;;  %s3523_s0 = inlined_call_operand.vmem [shape: f32[4,512], index: 0, kind: input, shape index: {}]   ;;  %s3524_s1 = inlined_call_operand.vmem [shape: f32[9,4,4], index: 1, kind: input, shape index: {}]   ;;  %s3525_s3 = inlined_call_operand.vmem [shape: f32[4,1], index: 3, kind: input, shape index: {}]   ;;  %s3526_s4 = inlined_call_operand.vmem [shape: f32[4,1], index: 4, kind: input, shape index: {}]   ;;  %s3527_s2 = inlined_call_operand.vmem [shape: f32[9,4,4], index: 2, kind: input, shape index: {}]   ;;  %s3528_s5 = inlined_call_operand.vmem [shape: f32[4,1], index: 5, kind: input, shape index: {}]   ;;  %s3529_s6 = inlined_call_operand.vmem [shape: f32[4,1], index: 6, kind: input, shape index: {}]   ;;  %s3530_s7 = inlined_call_operand.vmem [shape: f32[4,512], index: 7, kind: output, shape index: {}]  }
   0x1   :  { %v27_v0 = vld [vmem:[%s3523_s0 + $0x8] sm:$0xff]  ;;  %v26_v1 = vld [vmem:[%s3523_s0] sm:$0xff]  ;;  %s2597_s0 = smov 112   ;;  %s2599_s30 = smov 127   ;;  %v3574_v59 = vmov 0 }
   0x2   :  { %49 = vst [vmem:[#allocation1 + $0x10] ss:$2 sm:$0xff] %v27_v0  ;;  %v2678_v23 = vand.u32 127, %v28_v22  ;;  %v2422_v55 = vld [vmem:[%s3524_s1 + $0x4] sm:$0xf] }
   0x3   :  { %47 = vst [vmem:[#allocation1] ss:$2 sm:$0xff] %v26_v1  ;;  %v108_v63 = vld [vmem:[%s3524_s1] sm:$0xf] }
   0x4   :  { %v2681_v24 = vadd.s32 384, %v2678_v23  ;;  %v2684_v25 = vadd.s32 128, %v2678_v23  ;;  %v2687_v26 = vadd.s32 256, %v2678_v23  ;;  %v37_v27 = vshra.s32 %v2678_v23, 4 }
   0x5   :  { %vm3532_vm0 = vcmp.lt.s32.totalorder %v2678_v23, 16  ;;  %vm3531_vm6 = vcmp.lt.s32.totalorder %v2678_v23, 112  ;;  %vm3537_vm9 = vcmp.lt.s32.totalorder %v2678_v23, 1 }
   0x6   :  { %v40_v28 = vshra.s32 %v2681_v24, 4  ;;  %v38_v30 = vshra.s32 %v2684_v25, 4  ;;  %v39_v31 = vshra.s32 %v2687_v26, 4  ;;  %v2693_v33 = vand.u32 15, %v37_v27 }
   0x7   :  { %v35_v57 = vand.u32 15, %v2687_v26  ;;  %v34_v61 = vand.u32 15, %v2684_v25 }
   0x8   :  { %v2695_v34 = vand.u32 15, %v40_v28  ;;  %v2697_v35 = vand.u32 15, %v38_v30  ;;  %v2699_v36 = vand.u32 15, %v39_v31  ;;  %vm3536_vm1 = vcmp.ge.s32.totalorder %v2693_v33, 1 }
   0x9   :  { %v52_v2 = vld.sshfl [vmem:[#allocation1 + $0x10] sm:$0xff pattern:$0x75316420]  ;;  %v53_v3 = vld.sshfl [vmem:[#allocation1 + $0x18] sm:$0xff pattern:$0x75316420] }
   0xa   :  { %62 = vrot.lane.b32.xlu1 %v52_v2, %s2596_s28  ;;  %v50_v4 = vld.sshfl [vmem:[#allocation1] sm:$0xff pattern:$0x75316420]  ;;  %451 = vst [vmem:[#allocation1 + $0x10] ss:$2 sm:$0xff] %v27_v0  ;;  %vm3535_vm2 = vcmp.ge.s32.totalorder %v2695_v34, 1 }
   0xb   :  { %58 = vrot.lane.b32.xlu0 %v50_v4, %s2596_s28  ;;  %v51_v5 = vld.sshfl [vmem:[#allocation1 + $0x8] sm:$0xff pattern:$0x75316420]  ;;  %vm3533_vm4 = vcmp.ge.s32.totalorder %v2697_v35, 1  ;;  %vm3534_vm5 = vcmp.ge.s32.totalorder %v2699_v36, 1  ;;  %vm2790_vm8 = vcmp.ge.s32.totalorder %v35_v57, 1 }
   0xc   :  { %449 = vst [vmem:[#allocation1] ss:$2 sm:$0xff] %v26_v1  ;;  %v3573_v58 = vsel %vm2790_vm8, 4294967295, %v3572_v58  ;;  %vm2799_vm10 = vmand %vm3534_vm5, %vm2790_vm8  ;;  %vm2812_vm11 = vcmp.ge.s32.totalorder %v34_v61, 1  ;;  %v33_v2 = vand.u32 15, %v2678_v23  ;;  %v36_v4 = vand.u32 15, %v2681_v24 }
   0xd   :  { %v3575_v59 = vsel %vm2799_vm10, 4294967295, %v3574_v59  ;;  %vm2822_vm12 = vmand %vm3533_vm4, %vm2812_vm11  ;;  %v3593_v28 = vmov 0 }
   0xe   :  { %vm2831_vm13 = vcmp.ge.s32.totalorder %v33_v2, 1  ;;  %vm2836_vm14 = vcmp.ge.s32.totalorder %v36_v4, 1  ;;  %vm2840_vm15 = vcmp.lt.s32.totalorder %v36_v4, 15 }
  0x11   :  { %v2650_v6 = vld.sshfl [vmem:[#allocation1 + $0x10] sm:$0xff pattern:$0x75316420]  ;;  %v2652_v7 = vld.sshfl [vmem:[#allocation1 + $0x18] sm:$0xff pattern:$0x75316420] }
  0x12   :  { %64 = vrot.lane.b32.xlu1 %v53_v3, %s2596_s28  ;;  %589 = vst [vmem:[#allocation1 + $0x10] ss:$2 sm:$0xff] %v27_v0 }
  0x13   :  { %60 = vrot.lane.b32.xlu0 %v51_v5, %s2596_s28  ;;  %v2656_v8 = vld.sshfl [vmem:[#allocation1] sm:$0xff pattern:$0x75316420]  ;;  %v2658_v9 = vld.sshfl [vmem:[#allocation1 + $0x8] sm:$0xff pattern:$0x75316420] }
  0x14   :  { %587 = vst [vmem:[#allocation1] ss:$2 sm:$0xff] %v26_v1 }
  0x19   :  { %v2660_v10 = vld.sshfl [vmem:[#allocation1 + $0x10] sm:$0xff pattern:$0x75316420]  ;;  %v2662_v11 = vld.sshfl [vmem:[#allocation1 + $0x18] sm:$0xff pattern:$0x75316420] }
  0x1a   :  { %691 = vst [vmem:[#allocation1 + $0x10] ss:$2 sm:$0xff] %v27_v0 }
  0x1b   :  { %v2664_v12 = vld.sshfl [vmem:[#allocation1] sm:$0xff pattern:$0x75316420]  ;;  %v2666_v13 = vld.sshfl [vmem:[#allocation1 + $0x8] sm:$0xff pattern:$0x75316420] }
  0x1c   :  { %689 = vst [vmem:[#allocation1] ss:$2 sm:$0xff] %v26_v1 }
  0x21   :  { %v2668_v14 = vld.sshfl [vmem:[#allocation1 + $0x10] sm:$0xff pattern:$0x75316420]  ;;  %v2670_v15 = vld.sshfl [vmem:[#allocation1 + $0x18] sm:$0xff pattern:$0x75316420] }
  0x22   :  { %827 = vst [vmem:[#allocation1 + $0x10] ss:$2 sm:$0xff] %v27_v0 }
  0x23   :  { %v692_v16 = vld.sshfl [vmem:[#allocation1] sm:$0xff pattern:$0x75316420]  ;;  %v2672_v17 = vld.sshfl [vmem:[#allocation1 + $0x8] sm:$0xff pattern:$0x75316420] }
  0x24   :  { %825 = vst [vmem:[#allocation1] ss:$2 sm:$0xff] %v26_v1 }
  0x29   :  { %v830_v18 = vld.sshfl [vmem:[#allocation1 + $0x10] sm:$0xff pattern:$0x75316420]  ;;  %v831_v19 = vld.sshfl [vmem:[#allocation1 + $0x18] sm:$0xff pattern:$0x75316420] }
  0x2a   :  { %840 = vrot.lane.b32.xlu1 %v830_v18, %s2597_s0  ;;  %842 = vrot.lane.b32.xlu2 %v831_v19, %s2597_s0  ;;  %2389 = vst [vmem:[#allocation1 + $0x10] ss:$2 sm:$0xff] %v27_v0  ;;  %v3591_v18 = vmov 0 }
  0x2b   :  { %v829_v20 = vld.sshfl [vmem:[#allocation1 + $0x8] sm:$0xff pattern:$0x75316420]  ;;  %v828_v21 = vld.sshfl [vmem:[#allocation1] sm:$0xff pattern:$0x75316420] }
  0x2c   :  { %838 = vrot.lane.b32.xlu0 %v829_v20, %s2597_s0  ;;  %2387 = vst [vmem:[#allocation1] ss:$2 sm:$0xff] %v26_v1 }
  0x32   :  { %836 = vrot.lane.b32.xlu1 %v828_v21, %s2597_s0 }
  0x7c   :  { %v63_v29 = vpop.permute.xlu1 %62 }
  0x7d   :  { %v59_v32 = vpop.permute.xlu0 %58 }
  0x84   :  { %v65_v37 = vpop.permute.xlu1 %64  ;;  %v843_v47 = vpop.permute.xlu2 %842 }
  0x85   :  { %v70_v38 = vsel %vm3532_vm0, %v65_v37, %v59_v32  ;;  %v61_v39 = vpop.permute.xlu0 %60  ;;  %v67_v40 = vsel %vm3532_vm0, %v63_v29, %v65_v37 }
  0x86   :  { %v68_v41 = vsel %vm3532_vm0, %v61_v39, %v63_v29  ;;  %v69_v42 = vsel %vm3532_vm0, %v59_v32, %v61_v39  ;;  %77 = vrot.lane.b32.xlu0 %v67_v40, %s2598_s29  ;;  %321 = vrot.lane.b32.xlu1 %v67_v40, %s2599_s30  ;;  %v117_v43 = vsel %vm3536_vm1, %v70_v38, 0.0  ;;  %v120_v44 = vsel %vm3535_vm2, %v67_v40, 0.0 }
  0x87   :  { %73 = vrot.lane.b32.xlu2 %v69_v42, %s2598_s29  ;;  %2423 = vmatpush.msk.msra.mxu0 %vm127_vm3, %v117_v43  ;;  %v118_v45 = vsel %vm3533_vm4, %v69_v42, 0.0  ;;  %v119_v46 = vsel %vm3534_vm5, %v68_v41, 0.0  ;;  %vm3539_vm0 = vcmp.lt.s32.totalorder %v2678_v23, 127  ;;  %vm2858_vm4 = vmand %vm3535_vm2, %vm2836_vm14  ;;  %v3597_v29 = vmov 0 }
  0x88   :  { %2425 = vmatpush.msk.msra.mxu1 %vm127_vm3, %v118_v45  ;;  %2427 = vmatpush.msk.msra.mxu2 %vm127_vm3, %v119_v46  ;;  %vm2866_vm5 = vmand %vm3535_vm2, %vm2840_vm15  ;;  %vm2886_vm2 = vcmp.lt.s32.totalorder %v35_v57, 15  ;;  %v3605_v43 = vmov 0  ;;  %v3612_v45 = vmov 0 }
  0x89   :  { %2429 = vmatpush.msk.msra.mxu3 %vm127_vm3, %v120_v44  ;;  %2428 = vmatmul.msk.f32.vlgmr.msra.gmra.mxu2 %vm3538_vm7, %v2422_v55  ;;  %v3592_v18 = vsel %vm2866_vm5, 4294967295, %v3591_v18  ;;  %v3594_v28 = vsel %vm2886_vm2, 4294967295, %v3593_v28  ;;  %v3609_v44 = vmov 0 }
  0x8a   :  { %2430 = vmatmul.msk.f32.vlgmr.msra.gmra.mxu3 %vm3538_vm7, %v2422_v55  ;;  %2424 = vmatmul.msk.f32.vlgmr.msra.gmra.mxu0 %vm3538_vm7, %v2422_v55  ;;  %3595 = vst [vmem:[#allocation3_spill] sm:$0xff] %v3594_v28 }
  0x8b   :  { %2426 = vmatmul.msk.f32.vlgmr.msra.gmra.mxu1 %vm3538_vm7, %v2422_v55 }
  0x8e   :  { %319 = vrot.lane.b32.xlu0 %v68_v41, %s2599_s30  ;;  %462 = vrot.lane.b32.xlu1 %v2658_v9, %s2598_s29  ;;  %v3582_v9 = vmov 0 }
  0x8f   :  { %75 = vrot.lane.b32.xlu2 %v68_v41, %s2598_s29  ;;  %v3583_v9 = vsel %vm2836_vm14, 4294967295, %v3582_v9 }
  0x96   :  { %317 = vrot.lane.b32.xlu0 %v69_v42, %s2599_s30  ;;  %460 = vrot.lane.b32.xlu1 %v2656_v8, %s2598_s29  ;;  %v3600_v42 = vmov 0 }
  0x97   :  { %71 = vrot.lane.b32.xlu2 %v70_v38, %s2598_s29 }
  0x9c   :  { %v841_v48 = vpop.permute.xlu1 %840 }
  0x9d   :  { %v2744_v49 = vsel %vm3531_vm6, %v841_v48, %v843_v47 }
  0x9e   :  { %466 = vrot.lane.b32.xlu0 %v2652_v7, %s2598_s29  ;;  %700 = vrot.lane.b32.xlu1 %v692_v16, %s2599_s30  ;;  %v839_v50 = vpop.permute.xlu0 %838  ;;  %v3589_v16 = vmov 0 }
  0x9f   :  { %315 = vrot.lane.b32.xlu2 %v70_v38, %s2599_s30  ;;  %v2754_v51 = vsel %vm3531_vm6, %v839_v50, %v841_v48  ;;  %v3590_v16 = vsel %vm2858_vm4, 4294967295, %v3589_v16  ;;  %v2439_v38 = vld [vmem:[%s3524_s1 + $0x8] sm:$0xf] }
  0xa4   :  { %v837_v52 = vpop.permute.xlu1 %836 }
  0xa5   :  { %v2764_v53 = vsel %vm3531_vm6, %v837_v52, %v839_v50  ;;  %v2774_v54 = vsel %vm3531_vm6, %v843_v47, %v837_v52  ;;  %vm2849_vm6 = vmand %vm3536_vm1, %vm2831_vm13  ;;  %vm3596_vm1 = vcmp.ge.s32.totalorder %v2699_v36, 1 }
  0xa6   :  { %706 = vrot.lane.b32.xlu0 %v2670_v15, %s2599_s30  ;;  %853 = vrot.lane.b32.xlu1 %v2744_v49, %s2598_s29  ;;  %v3587_v15 = vmov 0 }
  0xa7   :  { %464 = vrot.lane.b32.xlu2 %v2650_v6, %s2598_s29  ;;  %v3588_v15 = vsel %vm2849_vm6, 4294967295, %v3587_v15 }
  0xae   :  { %851 = vrot.lane.b32.xlu0 %v2754_v51, %s2598_s29  ;;  %1099 = vrot.lane.b32.xlu1 %v2744_v49, %s2599_s30 }
  0xaf   :  { %704 = vrot.lane.b32.xlu2 %v2668_v14, %s2599_s30  ;;  %v3584_v14 = vmov 0 }
  0xb0   :  { %v3585_v14 = vsel %vm2840_vm15, 4294967295, %v3584_v14 }
  0xb1   :  { %3586 = vst [vmem:[#allocation2_spill] sm:$0xff] %v3585_v14 }
  0xb6   :  { %1097 = vrot.lane.b32.xlu1 %v2754_v51, %s2599_s30  ;;  %849 = vrot.lane.b32.xlu0 %v2764_v53, %s2598_s29 }
  0xb7   :  { %702 = vrot.lane.b32.xlu2 %v2672_v17, %s2599_s30 }
  0xbe   :  { %1095 = vrot.lane.b32.xlu0 %v2764_v53, %s2599_s30 }
  0xbf   :  { %855 = vrot.lane.b32.xlu2 %v2774_v54, %s2598_s29 }
  0xc7   :  { %1101 = vrot.lane.b32.xlu2 %v2774_v54, %s2599_s30 }
  0xe1   :  { %v74_v56 = vpop.permute.xlu2 %73 }
  0xe9   :  { %v76_v60 = vpop.permute.xlu2 %75 }
  0xea   :  { %v81_v62 = vsel %vm3537_vm9, %v74_v56, %v76_v60 }
  0xeb   :  { %v106_v0 = vsel %vm2799_vm10, %v81_v62, 0.0  ;;  %vm3616_vm10 = vcmp.lt.s32.totalorder %v2678_v23, 1 }
  0xec   :  { %2435 = vmatpush.msk.msrb.mxu2 %vm127_vm3, %v106_v0 }
  0xed   :  { %2436 = vmatmul.msk.f32.vlgmr.msrb.gmra.mxu2 %vm3538_vm7, %v108_v63 }
  0xf1   :  { %v72_v5 = vpop.permute.xlu2 %71 }
  0xf2   :  { %v82_v6 = vsel %vm3537_vm9, %v72_v5, %v74_v56 }
  0xf3   :  { %v105_v7 = vsel %vm2822_vm12, %v82_v6, 0.0 }
  0xf4   :  { %2433 = vmatpush.msk.msrb.mxu1 %vm127_vm3, %v105_v7  ;;  %v2457_v7 = vld [vmem:[%s3524_s1 + $0x10] sm:$0xf] }
  0xf5   :  { %2434 = vmatmul.msk.f32.vlgmr.msrb.gmra.mxu1 %vm3538_vm7, %v108_v63 }
  0xf8   :  { %v78_v17 = vpop.permute.xlu0 %77  ;;  %v322_v19 = vpop.permute.xlu1 %321 }
  0xf9   :  { %v316_v20 = vpop.permute.xlu2 %315  ;;  %v80_v21 = vsel %vm3537_vm9, %v76_v60, %v78_v17  ;;  %v83_v22 = vsel %vm3537_vm9, %v78_v17, %v72_v5  ;;  %vm2895_vm9 = vmand %vm3596_vm1, %vm2886_vm2  ;;  %vm2911_vm1 = vcmp.lt.s32.totalorder %v33_v2, 15  ;;  %v2448_v60 = vld [vmem:[%s3524_s1 + $0xc] sm:$0xf] }
  0xfa   :  { %v327_v24 = vsel %vm3539_vm0, %v322_v19, %v316_v20  ;;  %v104_v25 = vsel %vm2849_vm6, %v83_v22, 0.0  ;;  %v107_v26 = vsel %vm2858_vm4, %v80_v21, 0.0  ;;  %v3598_v29 = vsel %vm2895_vm9, 4294967295, %v3597_v29 }
  0xfb   :  { %v347_v27 = vsel %vm2866_vm5, %v327_v24, 0.0  ;;  %2431 = vmatpush.msk.msrb.mxu0 %vm127_vm3, %v104_v25  ;;  %2437 = vmatpush.msk.msrb.mxu3 %vm127_vm3, %v107_v26  ;;  %v3601_v42 = vsel %vm2911_vm1, 4294967295, %v3600_v42  ;;  %vm2917_vm4 = vcmp.lt.s32.totalorder %v34_v61, 15  ;;  %vm3614_vm6 = vcmp.lt.s32.totalorder %v2678_v23, 127 }
  0xfc   :  { %2438 = vmatmul.msk.f32.vlgmr.msrb.gmra.mxu3 %vm3538_vm7, %v108_v63  ;;  %2432 = vmatmul.msk.f32.vlgmr.msrb.gmra.mxu0 %vm3538_vm7, %v108_v63  ;;  %vm3599_vm7 = vcmp.lt.s32.totalorder %v2678_v23, 1  ;;  %3602 = vst [vmem:[#allocation4_spill] sm:$0xff] %v3601_v42  ;;  %v3606_v43 = vsel %vm2917_vm4, 4294967295, %v3605_v43  ;;  %v3627_v21 = vmov 0 }
  0xfd   :  { %2446 = vmatpush.msk.msra.mxu3 %vm127_vm3, %v347_v27  ;;  %3607 = vst [vmem:[#allocation5_spill] sm:$0xff] %v3606_v43 }
 0x100   :  { %v320_v30 = vpop.permute.xlu0 %319  ;;  %v463_v31 = vpop.permute.xlu1 %462 }
 0x101   :  { %v465_v32 = vpop.permute.xlu2 %464  ;;  %v324_v37 = vsel %vm3539_vm0, %v320_v30, %v322_v19  ;;  %vm3603_vm0 = vcmask 31744  }
 0x102   :  { %v346_v39 = vsel %vm2895_vm9, %v324_v37, 0.0  ;;  %v469_v40 = vsel %vm3599_vm7, %v463_v31, %v465_v32  ;;  %vm3604_vm5 = vmmov %vm3603_vm0  ;;  %vm3608_vm7 = vcmp.ge.s32.totalorder %v2693_v33, 1 }
 0x103   :  { %v482_v41 = vsel %vm2790_vm8, %v469_v40, 0.0  ;;  %2444 = vmatpush.msk.msra.mxu2 %vm127_vm3, %v346_v39  ;;  %vm2926_vm9 = vmand %vm3608_vm7, %vm2911_vm1 }
 0x104   :  { %2445 = vmatmul.msk.f32.vlgmr.msra.gmra.mxu2 %vm3603_vm0, %v2439_v38  ;;  %2447 = vmatmul.msk.f32.vlgmr.msra.gmra.mxu3 %vm3604_vm5, %v2439_v38  ;;  %v3610_v44 = vsel %vm2926_vm9, 4294967295, %v3609_v44  ;;  %vm3611_vm0 = vcmp.ge.s32.totalorder %v2697_v35, 1  ;;  %vm3615_vm7 = vmmov %vm3614_vm6 }
 0x105   :  { %2453 = vmatpush.msk.msrb.mxu2 %vm127_vm3, %v482_v41  ;;  %vm2936_vm5 = vmand %vm3611_vm0, %vm2917_vm4 }
 0x106   :  { %v3613_v45 = vsel %vm2936_vm5, 4294967295, %v3612_v45 }
 0x107   :  { %2462 = vmatpush.msk.msra.mxu2 %vm127_vm3, %v2660_v10 }
 0x108   :  { %v318_v46 = vpop.permute.xlu0 %317  ;;  %v461_v47 = vpop.permute.xlu1 %460 }
 0x109   :  { %v705_v48 = vpop.permute.xlu2 %704  ;;  %v325_v50 = vsel %vm3614_vm6, %v318_v46, %v320_v30  ;;  %v326_v52 = vsel %vm3615_vm7, %v316_v20, %v318_v46  ;;  %v470_v10 = vsel %vm3616_vm10, %v461_v47, %v463_v31  ;;  %vm3617_vm6 = vcmask 31744   ;;  %v2466_v30 = vld [vmem:[%s3524_s1 + $0x14] sm:$0xf]  ;;  %v2475_v46 = vld [vmem:[%s3524_s1 + $0x18] sm:$0xf] }
 0x10a   :  { %v344_v55 = vsel %vm2926_vm9, %v326_v52, 0.0  ;;  %v345_v56 = vsel %vm2936_vm5, %v325_v50, 0.0  ;;  %v481_v57 = vsel %vm2812_vm11, %v470_v10, 0.0  ;;  %vm3618_vm10 = vmmov %vm3617_vm6  ;;  %vm3620_vm7 = vcmp.lt.s32.totalorder %v2678_v23, 1 }
 0x10b   :  { %2440 = vmatpush.msk.msra.mxu0 %vm127_vm3, %v344_v55  ;;  %2442 = vmatpush.msk.msra.mxu1 %vm127_vm3, %v345_v56  ;;  %vm3619_vm0 = vmmov %vm3617_vm6 }
 0x10c   :  { %2441 = vmatmul.msk.f32.vlgmr.msra.gmra.mxu0 %vm3617_vm6, %v2439_v38  ;;  %2443 = vmatmul.msk.f32.vlgmr.msra.gmra.mxu1 %vm3618_vm10, %v2439_v38  ;;  %vm3621_vm5 = vmmov %vm3620_vm7  ;;  %vm3622_vm6 = vcmp.lt.s32.totalorder %v2678_v23, 127 }
 0x10d   :  { %2454 = vmatmul.msk.f32.vlgmr.msrb.gmra.mxu2 %vm3619_vm0, %v2448_v60  ;;  %2451 = vmatpush.msk.msrb.mxu1 %vm127_vm3, %v481_v57  ;;  %vm3623_vm10 = vmmov %vm3622_vm6 }
 0x10f   :  { %2460 = vmatpush.msk.msra.mxu1 %vm127_vm3, %v2666_v13 }
 0x110   :  { %v467_v61 = vpop.permute.xlu0 %466  ;;  %v701_v62 = vpop.permute.xlu1 %700 }
 0x111   :  { %v703_v63 = vpop.permute.xlu2 %702  ;;  %v468_v0 = vsel %vm3620_vm7, %v465_v32, %v467_v61  ;;  %v471_v2 = vsel %vm3621_vm5, %v467_v61, %v461_v47  ;;  %vm3624_vm5 = vmmov %vm3619_vm0  ;;  %v3637_v32 = vmov 0  ;;  %v3641_v47 = vmov 0 }
 0x112   :  { %v709_v4 = vsel %vm3622_vm6, %v703_v63, %v705_v48  ;;  %v480_v5 = vsel %vm2831_vm13, %v471_v2, 0.0  ;;  %v483_v6 = vsel %vm2836_vm14, %v468_v0, 0.0  ;;  %v710_v13 = vsel %vm3623_vm10, %v701_v62, %v703_v63  ;;  %vm3625_vm7 = vmmov %vm3619_vm0  ;;  %v2484_v2 = vld [vmem:[%s3524_s1 + $0x1c] sm:$0xf] }
 0x113   :  { %2449 = vmatpush.msk.msrb.mxu0 %vm127_vm3, %v480_v5  ;;  %2455 = vmatpush.msk.msrb.mxu3 %vm127_vm3, %v483_v6  ;;  %v721_v17 = vsel %vm2917_vm4, %v709_v4, 0.0  ;;  %v720_v19 = vsel %vm2911_vm1, %v710_v13, 0.0  ;;  %vm3626_vm6 = vmmov %vm3619_vm0  ;;  %vm3546_vm10 = vcmp.lt.s32.totalorder %v2695_v34, 15  ;;  %v3657_v63 = vmov 0 }
 0x114   :  { %2450 = vmatmul.msk.f32.vlgmr.msrb.gmra.mxu0 %vm3624_vm5, %v2448_v60  ;;  %2452 = vmatmul.msk.f32.vlgmr.msrb.gmra.mxu1 %vm3619_vm0, %v2448_v60  ;;  %vm2999_vm5 = vmand %vm3546_vm10, %vm2836_vm14  ;;  %vm3630_vm0 = vcmp.lt.s32.totalorder %v2678_v23, 127 }
 0x115   :  { %2456 = vmatmul.msk.f32.vlgmr.msrb.gmra.mxu3 %vm3625_vm7, %v2448_v60  ;;  %2463 = vmatmul.msk.f32.vlgmr.msra.gmra.mxu2 %vm3626_vm6, %v2457_v7  ;;  %v3628_v21 = vsel %vm2999_vm5, 4294967295, %v3627_v21  ;;  %vm3631_vm7 = vmmov %vm3630_vm0  ;;  %vm3632_vm6 = vcmp.lt.s32.totalorder %v2678_v23, 1 }
 0x116   :  { %2464 = vmatpush.msk.msra.mxu3 %vm127_vm3, %v2662_v11  ;;  %2458 = vmatpush.msk.msra.mxu0 %vm127_vm3, %v2664_v12  ;;  %3629 = vst [vmem:[#allocation6_spill] sm:$0xff] %v3628_v21 }
 0x117   :  { %2469 = vmatpush.msk.msrb.mxu1 %vm127_vm3, %v721_v17 }
 0x118   :  { %2467 = vmatpush.msk.msrb.mxu0 %vm127_vm3, %v720_v19  ;;  %v707_v20 = vpop.permute.xlu0 %706  ;;  %v854_v22 = vpop.permute.xlu1 %853 }
 0x119   :  { %v708_v11 = vsel %vm3630_vm0, %v705_v48, %v707_v20  ;;  %v711_v12 = vsel %vm3631_vm7, %v707_v20, %v701_v62  ;;  %v856_v24 = vpop.permute.xlu2 %855  ;;  %vm3633_vm0 = vcmask 31744  }
 0x11a   :  { %v722_v25 = vsel %vm2886_vm2, %v708_v11, 0.0  ;;  %v723_v26 = vsel %vm2840_vm15, %v711_v12, 0.0  ;;  %v857_v27 = vsel %vm3632_vm6, %v854_v22, %v856_v24  ;;  %vm3634_vm7 = vmmov %vm3633_vm0  ;;  %vm3553_vm6 = vcmp.lt.s32.totalorder %v2699_v36, 15  ;;  %v197_v11 = vpop.f32.mrf.mxu2  ;;  %v157_v12 = vpop.f32.mrf.mxu0 }
 0x11b   :  { %v880_v31 = vsel %vm2999_vm5, %v857_v27, 0.0  ;;  %2471 = vmatpush.msk.msrb.mxu2 %vm127_vm3, %v722_v25  ;;  %2473 = vmatpush.msk.msrb.mxu3 %vm127_vm3, %v723_v26  ;;  %vm3635_vm10 = vmmov %vm3633_vm0  ;;  %v992_v50 = vsel %vm3553_vm6, %v2744_v49, 0.0  ;;  %v3649_v49 = vmov 0  ;;  %v217_v25 = vpop.f32.mrf.mxu3 }
 0x11c   :  { %2459 = vmatmul.msk.f32.vlgmr.msra.gmra.mxu0 %vm3633_vm0, %v2457_v7  ;;  %2461 = vmatmul.msk.f32.vlgmr.msra.gmra.mxu1 %vm3634_vm7, %v2457_v7  ;;  %vm3636_vm14 = vmmov %vm3633_vm0  ;;  %vm3640_vm0 = vcmp.lt.s32.totalorder %v2678_v23, 1 }
 0x11d   :  { %2465 = vmatmul.msk.f32.vlgmr.msra.gmra.mxu3 %vm3635_vm10, %v2457_v7  ;;  %2472 = vmatmul.msk.f32.vlgmr.msrb.gmra.mxu2 %vm3636_vm14, %v2466_v30  ;;  %vm3030_vm5 = vmand %vm3553_vm6, %vm2790_vm8  ;;  %vm3644_vm10 = vcmp.lt.s32.totalorder %v2678_v23, 127 }
 0x11e   :  { %2482 = vmatpush.msk.msra.mxu3 %vm127_vm3, %v880_v31  ;;  %v3638_v32 = vsel %vm3030_vm5, 4294967295, %v3637_v32  ;;  %vm3045_vm14 = vmand %vm3553_vm6, %vm2886_vm2  ;;  %vm3646_vm2 = vcmp.lt.s32.totalorder %v2695_v34, 15  ;;  %vm3660_vm6 = vcmp.lt.s32.totalorder %v2678_v23, 127 }
 0x11f   :  { %3639 = vst [vmem:[#allocation7_spill] sm:$0xff] %v3638_v32  ;;  %v3642_v47 = vsel %vm3045_vm14, 4294967295, %v3641_v47  ;;  %v993_v52 = vsel %vm3646_vm2, %v2774_v54, 0.0  ;;  %v3652_v54 = vmov 0 }
 0x120   :  { %v852_v37 = vpop.permute.xlu0 %851  ;;  %v1100_v38 = vpop.permute.xlu1 %1099  ;;  %3643 = vst [vmem:[#allocation8_spill] sm:$0xff] %v3642_v47 }
 0x121   :  { %v858_v39 = vsel %vm3640_vm0, %v852_v37, %v854_v22  ;;  %v1102_v40 = vpop.permute.xlu2 %1101  ;;  %vm3645_vm0 = vmmov %vm3634_vm7  ;;  %v2493_v22 = vld [vmem:[%s3524_s1 + $0x20] sm:$0xf] }
 0x122   :  { %v879_v41 = vsel %vm3030_vm5, %v858_v39, 0.0  ;;  %v1103_v48 = vsel %vm3644_vm10, %v1100_v38, %v1102_v40  ;;  %vm3556_vm5 = vcmp.lt.s32.totalorder %v2693_v33, 15  ;;  %vm3647_vm9 = vmmov %vm3645_vm0  ;;  %vm3555_vm10 = vcmp.lt.s32.totalorder %v2697_v35, 15 }
 0x123   :  { %2480 = vmatpush.msk.msra.mxu2 %vm127_vm3, %v879_v41  ;;  %vm3648_vm8 = vmmov %vm3645_vm0  ;;  %v1121_v10 = vsel %vm3045_vm14, %v1103_v48, 0.0  ;;  %v990_v4 = vsel %vm3556_vm5, %v2764_v53, 0.0  ;;  %v991_v5 = vsel %vm3555_vm10, %v2754_v51, 0.0  ;;  %v3665_v53 = vmov 0 }
 0x124   :  { %2468 = vmatmul.msk.f32.vlgmr.msrb.gmra.mxu0 %vm3634_vm7, %v2466_v30  ;;  %2470 = vmatmul.msk.f32.vlgmr.msrb.gmra.mxu1 %vm3645_vm0, %v2466_v30  ;;  %vm3072_vm7 = vmand %vm3556_vm5, %vm2831_vm13  ;;  %v3669_v51 = vmov 0 }
 0x125   :  { %2474 = vmatmul.msk.f32.vlgmr.msrb.gmra.mxu3 %vm3647_vm9, %v2466_v30  ;;  %2481 = vmatmul.msk.f32.vlgmr.msra.gmra.mxu2 %vm3648_vm8, %v2475_v46  ;;  %v3650_v49 = vsel %vm3072_vm7, 4294967295, %v3649_v49  ;;  %vm3081_vm2 = vmand %vm3555_vm10, %vm2812_vm11  ;;  %vm3655_vm8 = vcmp.lt.s32.totalorder %v2678_v23, 1 }
 0x126   :  { %2489 = vmatpush.msk.msrb.mxu2 %vm127_vm3, %v992_v50  ;;  %2491 = vmatpush.msk.msrb.mxu3 %vm127_vm3, %v993_v52  ;;  %3651 = vst [vmem:[#allocation9_spill] sm:$0xff] %v3650_v49  ;;  %v3653_v54 = vsel %vm3081_vm2, 4294967295, %v3652_v54  ;;  %vm3656_vm9 = vmmov %vm3655_vm8 }
 0x127   :  { %3654 = vst [vmem:[#allocation10_spill] sm:$0xff] %v3653_v54  ;;  %vm3097_vm0 = vmand %vm3555_vm10, %vm2917_vm4 }
 0x128   :  { %2498 = vmatpush.msk.msra.mxu2 %vm127_vm3, %v1121_v10  ;;  %v850_v55 = vpop.permute.xlu0 %849  ;;  %v1098_v56 = vpop.permute.xlu1 %1097  ;;  %v3658_v63 = vsel %vm3097_vm0, 4294967295, %v3657_v63 }
 0x129   :  { %v859_v57 = vsel %vm3655_vm8, %v850_v55, %v852_v37  ;;  %v860_v60 = vsel %vm3656_vm9, %v856_v24, %v850_v55  ;;  %3659 = vst [vmem:[#allocation11_spill] sm:$0xff] %v3658_v63  ;;  %v1104_v0 = vsel %vm3660_vm6, %v1098_v56, %v1100_v38  ;;  %vm3661_vm8 = vcmask 31744   ;;  %v177_v24 = vpop.f32.mrf.mxu1 }
 0x12a   :  { %v877_v61 = vsel %vm3072_vm7, %v860_v60, 0.0  ;;  %v878_v62 = vsel %vm3081_vm2, %v859_v57, 0.0  ;;  %vm3662_vm9 = vmmov %vm3661_vm8  ;;  %v1120_v6 = vsel %vm3097_vm0, %v1104_v0, 0.0 }
 0x12b   :  { %2476 = vmatpush.msk.msra.mxu0 %vm127_vm3, %v877_v61  ;;  %2478 = vmatpush.msk.msra.mxu1 %vm127_vm3, %v878_v62  ;;  %vm3663_vm6 = vmmov %vm3661_vm8 }
 0x12c   :  { %2477 = vmatmul.msk.f32.vlgmr.msra.gmra.mxu0 %vm3661_vm8, %v2475_v46  ;;  %2479 = vmatmul.msk.f32.vlgmr.msra.gmra.mxu1 %vm3662_vm9, %v2475_v46  ;;  %vm3664_vm2 = vmmov %vm3663_vm6  ;;  %vm3668_vm9 = vcmp.lt.s32.totalorder %v2695_v34, 15 }
 0x12d   :  { %2483 = vmatmul.msk.f32.vlgmr.msra.gmra.mxu3 %vm3663_vm6, %v2475_v46  ;;  %2485 = vmatpush.msk.msrb.mxu0 %vm127_vm3, %v990_v4  ;;  %vm3126_vm8 = vmand %vm3556_vm5, %vm2911_vm1 }
 0x12e   :  { %2487 = vmatpush.msk.msrb.mxu1 %vm127_vm3, %v991_v5  ;;  %2490 = vmatmul.msk.f32.vlgmr.msrb.gmra.mxu2 %vm3664_vm2, %v2484_v2  ;;  %v3666_v53 = vsel %vm3126_vm8, 4294967295, %v3665_v53  ;;  %vm3135_vm6 = vmand %vm3668_vm9, %vm2840_vm15  ;;  %vm3672_vm2 = vcmp.lt.s32.totalorder %v2678_v23, 127  ;;  %vm3674_vm9 = vcmask 31744  }
 0x12f   :  { %3667 = vst [vmem:[#allocation12_spill] sm:$0xff] %v3666_v53  ;;  %v3670_v51 = vsel %vm3135_vm6, 4294967295, %v3669_v51  ;;  %vm3673_vm10 = vmmov %vm3672_vm2 }
 0x130   :  { %2496 = vmatpush.msk.msra.mxu1 %vm127_vm3, %v1120_v6  ;;  %3671 = vst [vmem:[#allocation13_spill] sm:$0xff] %v3670_v51  ;;  %v1096_v13 = vpop.permute.xlu0 %1095 }
 0x131   :  { %v1105_v7 = vsel %vm3672_vm2, %v1096_v13, %v1098_v56  ;;  %v1106_v17 = vsel %vm3673_vm10, %v1102_v40, %v1096_v13  ;;  %vm3675_vm2 = vmmov %vm3674_vm9 }
 0x132   :  { %v1119_v19 = vsel %vm3126_vm8, %v1105_v7, 0.0  ;;  %v1122_v20 = vsel %vm3135_vm6, %v1106_v17, 0.0  ;;  %vm3676_vm5 = vmmov %vm3675_vm2 }
 0x133   :  { %2494 = vmatpush.msk.msra.mxu0 %vm127_vm3, %v1119_v19  ;;  %2500 = vmatpush.msk.msra.mxu3 %vm127_vm3, %v1122_v20  ;;  %vm3677_vm10 = vmmov %vm3675_vm2 }
 0x134   :  { %2486 = vmatmul.msk.f32.vlgmr.msrb.gmra.mxu0 %vm3674_vm9, %v2484_v2  ;;  %2488 = vmatmul.msk.f32.vlgmr.msrb.gmra.mxu1 %vm3675_vm2, %v2484_v2  ;;  %vm3678_vm8 = vmmov %vm3675_vm2  ;;  %vm3681_vm9 = vcmp.lt.s32.totalorder %v2678_v23, 16 }
 0x135   :  { %2492 = vmatmul.msk.f32.vlgmr.msrb.gmra.mxu3 %vm3676_vm5, %v2484_v2  ;;  %vm3679_vm0 = vmmov %vm3675_vm2  ;;  %vm3682_vm2 = vcmp.ge.s32.totalorder %v2693_v33, 1 }
 0x136   :  { %2499 = vmatmul.msk.f32.vlgmr.msra.gmra.mxu2 %vm3677_vm10, %v2493_v22  ;;  %vm3680_vm6 = vmmov %vm3679_vm0 }
 0x137   :  { %vm3683_vm10 = vmmov %vm3681_vm9 }
 0x13c   :  { %2495 = vmatmul.msk.f32.vlgmr.msra.gmra.mxu0 %vm3678_vm8, %v2493_v22  ;;  %2497 = vmatmul.msk.f32.vlgmr.msra.gmra.mxu1 %vm3679_vm0, %v2493_v22 }
 0x13d   :  { %2501 = vmatmul.msk.f32.vlgmr.msra.gmra.mxu3 %vm3680_vm6, %v2493_v22 }
 0x170   :  { %v292_v26 = vpop.f32.mrf.mxu2 }
 0x171   :  { %v293_v7 = vadd.f32 %v292_v26, %v197_v11 }
 0x172   :  { %v272_v30 = vpop.f32.mrf.mxu1 }
 0x173   :  { %v273_v6 = vadd.f32 %v272_v30, %v177_v24 }
 0x179   :  { %v252_v27 = vpop.f32.mrf.mxu0 }
 0x17a   :  { %v253_v5 = vadd.f32 %v252_v27, %v157_v12 }
 0x17f   :  { %v312_v31 = vpop.f32.mrf.mxu3 }
 0x180   :  { %v313_v47 = vadd.f32 %v312_v31, %v217_v25 }
 0x187   :  { %v422_v37 = vpop.f32.mrf.mxu2  ;;  %v442_v40 = vpop.f32.mrf.mxu3 }
 0x188   :  { %v447_v22 = vadd.f32 %v422_v37, %v293_v7  ;;  %v448_v28 = vadd.f32 %v442_v40, %v313_v47 }
 0x189   :  { %v382_v38 = vpop.f32.mrf.mxu0  ;;  %v402_v39 = vpop.f32.mrf.mxu1 }
 0x18a   :  { %v445_v13 = vadd.f32 %v382_v38, %v253_v5  ;;  %v446_v17 = vadd.f32 %v402_v39, %v273_v6 }
 0x190   :  { %v558_v41 = vpop.f32.mrf.mxu2 }
 0x191   :  { %v518_v46 = vpop.f32.mrf.mxu0  ;;  %v538_v48 = vpop.f32.mrf.mxu1  ;;  %v583_v32 = vadd.f32 %v558_v41, %v447_v22 }
 0x192   :  { %v581_v19 = vadd.f32 %v518_v46, %v445_v13  ;;  %v582_v51 = vadd.f32 %v538_v48, %v446_v17 }
 0x198   :  { %v578_v50 = vpop.f32.mrf.mxu3  ;;  %v662_v52 = vpop.f32.mrf.mxu2 }
 0x199   :  { %v622_v10 = vpop.f32.mrf.mxu0  ;;  %v642_v55 = vpop.f32.mrf.mxu1  ;;  %v687_v42 = vadd.f32 %v662_v52, %v583_v32  ;;  %v584_v24 = vadd.f32 %v578_v50, %v448_v28  ;;  %v2600_v50 = vmov 512.0  }
 0x19a   :  { %v685_v54 = vadd.f32 %v622_v10, %v581_v19  ;;  %v686_v21 = vadd.f32 %v642_v55, %v582_v51  ;;  %2590 = vrcp.f32 %v2600_v50 }
 0x1a0   :  { %v682_v56 = vpop.f32.mrf.mxu3  ;;  %v798_v57 = vpop.f32.mrf.mxu2 }
 0x1a1   :  { %v758_v60 = vpop.f32.mrf.mxu0  ;;  %v778_v61 = vpop.f32.mrf.mxu1  ;;  %v823_v27 = vadd.f32 %v798_v57, %v687_v42  ;;  %v688_v38 = vadd.f32 %v682_v56, %v584_v24 }
 0x1a2   :  { %v821_v14 = vadd.f32 %v758_v60, %v685_v54  ;;  %v822_v43 = vadd.f32 %v778_v61, %v686_v21  ;;  %v2591_v52 = vpop.eup %2590 }
 0x1a3   :  { %v1234_v55 = vmul.f32 512.0, %v2591_v52  ;;  %vm1238_vm5 = vweird.f32 %v2591_v52 }
 0x1a5   :  { %v1235_v56 = vsub.f32 1.0, %v1234_v55 }
 0x1a7   :  { %v1236_v57 = vmul.f32 %v2591_v52, %v1235_v56 }
 0x1a8   :  { %v818_v62 = vpop.f32.mrf.mxu3  ;;  %v955_v0 = vpop.f32.mrf.mxu2 }
 0x1a9   :  { %v915_v2 = vpop.f32.mrf.mxu0  ;;  %v935_v4 = vpop.f32.mrf.mxu1  ;;  %v980_v37 = vadd.f32 %v955_v0, %v823_v27  ;;  %v824_v31 = vadd.f32 %v818_v62, %v688_v38  ;;  %v1237_v60 = vadd.f32 %v2591_v52, %v1236_v57 }
 0x1aa   :  { %v978_v12 = vadd.f32 %v915_v2, %v821_v14  ;;  %v979_v11 = vadd.f32 %v935_v4, %v822_v43 }
 0x1ab   :  { %v3172_v61 = vsel %vm1238_vm5, %v2591_v52, %v1237_v60  ;;  %vm3684_vm5 = vcmp.ge.s32.totalorder %v2697_v35, 1 }
 0x1b0   :  { %v975_v20 = vpop.f32.mrf.mxu3 }
 0x1b1   :  { %v1068_v53 = vpop.f32.mrf.mxu2  ;;  %v1028_v63 = vpop.f32.mrf.mxu0  ;;  %v981_v28 = vadd.f32 %v975_v20, %v824_v31 }
 0x1b2   :  { %v1048_v49 = vpop.f32.mrf.mxu1  ;;  %v1091_v26 = vadd.f32 %v1028_v63, %v978_v12  ;;  %v1093_v51 = vadd.f32 %v1068_v53, %v980_v37 }
 0x1b3   :  { %v1092_v39 = vadd.f32 %v1048_v49, %v979_v11 }
 0x1b8   :  { %v1088_v30 = vpop.f32.mrf.mxu3 }
 0x1b9   :  { %v1157_v46 = vpop.f32.mrf.mxu0  ;;  %v1197_v48 = vpop.f32.mrf.mxu2  ;;  %v1094_v32 = vadd.f32 %v1088_v30, %v981_v28  ;;  %v2601_v30 = vmov 0  }
 0x1ba   :  { %v3159_v10 = vadd.f32 %v1157_v46, %v1091_v26  ;;  %v1177_v25 = vpop.f32.mrf.mxu1  ;;  %v3165_v42 = vadd.f32 %v1197_v48, %v1093_v51  ;;  %2588 = vset.pattern.permute.xlu1 %v2601_v30  ;;  %2589 = vset.pattern.permute.xlu0 %v2601_v30 }
 0x1bb   :  { %v3161_v54 = vadd.f32 %v1177_v25, %v1092_v39 }
 0x1bc   :  { %v1224_v14 = vsel %vm127_vm3, %v3159_v10, 0.0  ;;  %v1227_v63 = vsel %vm127_vm3, %v3165_v42, 0.0 }
 0x1bd   :  { %v1225_v43 = vsel %vm127_vm3, %v3161_v54, 0.0 }
 0x1be   :  { %v1226_v21 = vadd.f32 %v1225_v43, %v1224_v14  ;;  %v1259_v14 = vld [vmem:[%s3525_s3] sm:$0xf] }
 0x1c0   :  { %v1217_v47 = vpop.f32.mrf.mxu3  ;;  %v1228_v40 = vadd.f32 %v1227_v63, %v1226_v21 }
 0x1c1   :  { %v1223_v49 = vadd.f32 %v1217_v47, %v1094_v32  ;;  %v1272_v47 = vld [vmem:[%s3526_s4] sm:$0xf] }
 0x1c3   :  { %v1229_v53 = vsel %vm127_vm3, %v1223_v49, 0.0 }
 0x1c4   :  { %v1230_v41 = vadd.f32 %v1229_v53, %v1228_v40 }
 0x1c6   :  { %1231 = vadd.xlane.f32.xlu2 %v1230_v41 }
 0x239   :  { %v1232_v62 = vpop.xlane.xlu2 %1231 }
 0x23a   :  { %v1240_v0 = vmul.f32 %v3172_v61, %v1232_v62 }
 0x23c   :  { %v1241_v2 = vsub.f32 %v3159_v10, %v1240_v0  ;;  %v1242_v4 = vsub.f32 %v3161_v54, %v1240_v0  ;;  %v1243_v5 = vsub.f32 %v3165_v42, %v1240_v0  ;;  %v1244_v6 = vsub.f32 %v1223_v49, %v1240_v0 }
 0x23e   :  { %v1245_v13 = vmul.f32 %v1241_v2, %v1241_v2  ;;  %v1246_v7 = vmul.f32 %v1242_v4, %v1242_v4  ;;  %v1247_v17 = vmul.f32 %v1243_v5, %v1243_v5  ;;  %v1248_v19 = vmul.f32 %v1244_v6, %v1244_v6 }
 0x240   :  { %v1249_v20 = vsel %vm127_vm3, %v1245_v13, 0.0  ;;  %v1250_v22 = vsel %vm127_vm3, %v1246_v7, 0.0  ;;  %v1252_v24 = vsel %vm127_vm3, %v1247_v17, 0.0  ;;  %v1254_v11 = vsel %vm127_vm3, %v1248_v19, 0.0 }
 0x241   :  { %v1251_v12 = vadd.f32 %v1250_v22, %v1249_v20 }
 0x243   :  { %v1253_v27 = vadd.f32 %v1252_v24, %v1251_v12 }
 0x245   :  { %v1255_v26 = vadd.f32 %v1254_v11, %v1253_v27 }
 0x247   :  { %1256 = vadd.xlane.f32.xlu0 %v1255_v26 }
 0x2ba   :  { %v1257_v38 = vpop.xlane.xlu0 %1256 }
 0x2bb   :  { %v1258_v37 = vmul.f32 %v1257_v38, %v3172_v61 }
 0x2bd   :  { %v1260_v39 = vadd.f32 1e-05, %v1258_v37 }
 0x2bf   :  { %2592 = vrsqrt.f32 %v1260_v39  ;;  %vm1267_vm8 = vweird.f32 %v1260_v39 }
 0x2c5   :  { %v2593_v46 = vpop.eup %2592 }
 0x2c6   :  { %v1262_v48 = vmul.f32 %v2593_v46, %v1260_v39  ;;  %vm1268_vm0 = vweird.f32 %v2593_v46 }
 0x2c7   :  { %vm1269_vm6 = vmor %vm1267_vm8, %vm1268_vm0 }
 0x2c8   :  { %v1263_v25 = vmul.f32 %v2593_v46, %v1262_v48  ;;  %vm3685_vm0 = vmmov %vm3681_vm9 }
 0x2c9   :  { %vm3686_vm8 = vmmov %vm3685_vm0 }
 0x2ca   :  { %v1264_v31 = vmul.f32 0.5, %v1263_v25 }
 0x2cc   :  { %v1265_v51 = vsub.f32 1.5, %v1264_v31 }
 0x2ce   :  { %v1266_v28 = vmul.f32 %v2593_v46, %v1265_v51 }
 0x2d0   :  { %v1270_v43 = vsel %vm1269_vm6, %v2593_v46, %v1266_v28  ;;  %vm3687_vm6 = vcmp.ge.s32.totalorder %v2699_v36, 1  ;;  %v2502_v46 = vld [vmem:[%s3527_s2 + $0x4] sm:$0xf] }
 0x2d1   :  { %v1271_v21 = vmul.f32 %v1270_v43, %v1259_v14  ;;  %v1325_v14 = vld [vmem:[%s3527_s2] sm:$0xf] }
 0x2d3   :  { %1277 = vperm.xlu1 %2588, %v1271_v21   ;;  %v1273_v32 = vmul.f32 %v1271_v21, %v1240_v0 }
 0x2d5   :  { %v1274_v63 = vsub.f32 %v1272_v47, %v1273_v32 }
 0x2db   :  { %1286 = vperm.xlu1 %2588, %v1274_v63  }
 0x345   :  { %v1278_v40 = vpop.permute.xlu1 %1277 }
 0x346   :  { %v1280_v53 = vmul.f32 %v1278_v40, %v3159_v10  ;;  %v1283_v41 = vmul.f32 %v1278_v40, %v1223_v49  ;;  %v1281_v60 = vmul.f32 %v1278_v40, %v3161_v54  ;;  %v1282_v10 = vmul.f32 %v1278_v40, %v3165_v42 }
 0x34d   :  { %v1287_v50 = vpop.permute.xlu1 %1286 }
 0x34e   :  { %v1289_v52 = vadd.f32 %v1287_v50, %v1280_v53  ;;  %v1292_v55 = vadd.f32 %v1287_v50, %v1283_v41  ;;  %v1290_v62 = vadd.f32 %v1287_v50, %v1281_v60  ;;  %v1291_v49 = vadd.f32 %v1287_v50, %v1282_v10 }
 0x350   :  { %v3190_v56 = vmax.f32 %v1289_v52, 0.0  ;;  %v3192_v57 = vmax.f32 %v1292_v55, 0.0  ;;  %v3199_v0 = vmax.f32 %v1290_v62, 0.0  ;;  %v3206_v2 = vmax.f32 %v1291_v49, 0.0 }
 0x352   :  { %1303 = vrot.lane.b32.xlu2 %v3192_v57, %s2596_s28  ;;  %1297 = vrot.lane.b32.xlu1 %v3190_v56, %s2596_s28 }
 0x35a   :  { %1980 = vrot.lane.b32.xlu2 %v3192_v57, %s2597_s0  ;;  %1299 = vrot.lane.b32.xlu1 %v3199_v0, %s2596_s28 }
 0x362   :  { %1301 = vrot.lane.b32.xlu1 %v3206_v2, %s2596_s28 }
 0x36a   :  { %1976 = vrot.lane.b32.xlu1 %v3199_v0, %s2597_s0 }
 0x372   :  { %1978 = vrot.lane.b32.xlu1 %v3206_v2, %s2597_s0 }
 0x37a   :  { %1974 = vrot.lane.b32.xlu1 %v3190_v56, %s2597_s0 }
 0x3ac   :  { %v1304_v54 = vpop.permute.xlu2 %1303 }
 0x3b4   :  { %v1981_v11 = vpop.permute.xlu2 %1980 }
 0x3c4   :  { %v1298_v42 = vpop.permute.xlu1 %1297 }
 0x3c5   :  { %v1308_v4 = vsel %vm3681_vm9, %v1304_v54, %v1298_v42  ;;  %vm3688_vm9 = vcmp.ge.s32.totalorder %v2695_v34, 1 }
 0x3c6   :  { %1309 = vrot.lane.b32.xlu2 %v1308_v4, %s2598_s29  ;;  %v1326_v5 = vsel %vm3682_vm2, %v1308_v4, 0.0  ;;  %vm3689_vm2 = vcmp.lt.s32.totalorder %v2678_v23, 112 }
 0x3c7   :  { %2503 = vmatpush.msk.msrb.mxu0 %vm127_vm3, %v1326_v5 }
 0x3cc   :  { %v1300_v6 = vpop.permute.xlu1 %1299 }
 0x3cd   :  { %v1307_v13 = vsel %vm3683_vm10, %v1298_v42, %v1300_v6  ;;  %vm3690_vm10 = vmmov %vm3689_vm2 }
 0x3ce   :  { %1522 = vrot.lane.b32.xlu2 %v1308_v4, %s2599_s30  ;;  %1311 = vrot.lane.b32.xlu1 %v1307_v13, %s2598_s29  ;;  %v1327_v7 = vsel %vm3684_vm5, %v1307_v13, 0.0  ;;  %vm3691_vm5 = vmmov %vm3689_vm2 }
 0x3cf   :  { %2505 = vmatpush.msk.msrb.mxu1 %vm127_vm3, %v1327_v7 }
 0x3d4   :  { %v1302_v17 = vpop.permute.xlu1 %1301 }
 0x3d5   :  { %v1306_v19 = vsel %vm3685_vm0, %v1300_v6, %v1302_v17  ;;  %v1305_v20 = vsel %vm3686_vm8, %v1302_v17, %v1304_v54  ;;  %vm3692_vm0 = vmmov %vm3689_vm2  ;;  %vm3693_vm8 = vcmask 31744  }
 0x3d6   :  { %1643 = vrot.lane.b32.xlu2 %v3206_v2, %s2598_s29  ;;  %1313 = vrot.lane.b32.xlu0 %v1306_v19, %s2598_s29  ;;  %v1328_v22 = vsel %vm3687_vm6, %v1306_v19, 0.0  ;;  %v1329_v12 = vsel %vm3688_vm9, %v1305_v20, 0.0  ;;  %vm3694_vm6 = vmmov %vm3693_vm8 }
 0x3d7   :  { %1528 = vrot.lane.b32.xlu1 %v1305_v20, %s2599_s30  ;;  %2507 = vmatpush.msk.msrb.mxu2 %vm127_vm3, %v1328_v22  ;;  %vm3695_vm9 = vmmov %vm3694_vm6 }
 0x3d8   :  { %2509 = vmatpush.msk.msrb.mxu3 %vm127_vm3, %v1329_v12  ;;  %2508 = vmatmul.msk.f32.vlgmr.msrb.gmra.mxu2 %vm3693_vm8, %v2502_v46  ;;  %vm3700_vm8 = vnez %v3575_v59 }
 0x3d9   :  { %2510 = vmatmul.msk.f32.vlgmr.msrb.gmra.mxu3 %vm3694_vm6, %v2502_v46  ;;  %2504 = vmatmul.msk.f32.vlgmr.msrb.gmra.mxu0 %vm3695_vm9, %v2502_v46 }
 0x3dc   :  { %v1977_v24 = vpop.permute.xlu1 %1976 }
 0x3de   :  { %1861 = vrot.lane.b32.xlu2 %v3206_v2, %s2599_s30  ;;  %1315 = vrot.lane.b32.xlu0 %v1305_v20, %s2598_s29 }
 0x3df   :  { %1641 = vrot.lane.b32.xlu1 %v3199_v0, %s2598_s29 }
 0x3e4   :  { %v1979_v27 = vpop.permute.xlu1 %1978 }
 0x3e5   :  { %v3266_v38 = vsel %vm3690_vm10, %v1979_v27, %v1981_v11  ;;  %v3278_v37 = vsel %vm3691_vm5, %v1977_v24, %v1979_v27  ;;  %vm3697_vm10 = vcmp.lt.s32.totalorder %v2678_v23, 1 }
 0x3e6   :  { %1859 = vrot.lane.b32.xlu2 %v3199_v0, %s2599_s30  ;;  %1526 = vrot.lane.b32.xlu0 %v1306_v19, %s2599_s30 }
 0x3e7   :  { %1639 = vrot.lane.b32.xlu1 %v3190_v56, %s2598_s29 }
 0x3ec   :  { %v1975_v26 = vpop.permute.xlu1 %1974 }
 0x3ed   :  { %v3255_v30 = vsel %vm3689_vm2, %v1981_v11, %v1975_v26  ;;  %v3286_v39 = vsel %vm3692_vm0, %v1975_v26, %v1977_v24  ;;  %vm3696_vm2 = vmmov %vm3694_vm6  ;;  %vm3702_vm6 = vcmp.lt.s32.totalorder %v2678_v23, 127 }
 0x3ee   :  { %1524 = vrot.lane.b32.xlu0 %v1307_v13, %s2599_s30  ;;  %1992 = vrot.lane.b32.xlu2 %v3255_v30, %s2598_s29  ;;  %vm3698_vm5 = vmmov %vm3696_vm2 }
 0x3ef   :  { %1857 = vrot.lane.b32.xlu1 %v3190_v56, %s2599_s30  ;;  %2506 = vmatmul.msk.f32.vlgmr.msrb.gmra.mxu1 %vm3696_vm2, %v2502_v46  ;;  %vm3699_vm0 = vmmov %vm3697_vm10 }
 0x3f0   :  { %vm3703_vm9 = vmmov %vm3699_vm0 }
 0x3f6   :  { %1645 = vrot.lane.b32.xlu0 %v3192_v57, %s2598_s29  ;;  %2214 = vrot.lane.b32.xlu2 %v3255_v30, %s2599_s30 }
 0x3f7   :  { %1990 = vrot.lane.b32.xlu1 %v3266_v38, %s2598_s29 }
 0x3fe   :  { %1863 = vrot.lane.b32.xlu0 %v3192_v57, %s2599_s30 }
 0x3ff   :  { %2212 = vrot.lane.b32.xlu1 %v3266_v38, %s2599_s30 }
 0x406   :  { %1988 = vrot.lane.b32.xlu0 %v3278_v37, %s2598_s29 }
 0x407   :  { %2210 = vrot.lane.b32.xlu1 %v3278_v37, %s2599_s30 }
 0x40e   :  { %1986 = vrot.lane.b32.xlu0 %v3286_v39, %s2598_s29 }
 0x416   :  { %2208 = vrot.lane.b32.xlu0 %v3286_v39, %s2599_s30 }
 0x420   :  { %v1310_v48 = vpop.permute.xlu2 %1309 }
 0x428   :  { %v1523_v28 = vpop.permute.xlu2 %1522 }
 0x430   :  { %v1644_v50 = vpop.permute.xlu2 %1643 }
 0x438   :  { %v1862_v49 = vpop.permute.xlu2 %1861 }
 0x440   :  { %v1312_v25 = vpop.permute.xlu1 %1311 }
 0x441   :  { %v1319_v31 = vsel %vm3697_vm10, %v1310_v48, %v1312_v25  ;;  %vm3705_vm10 = vnez %v3588_v15 }
 0x442   :  { %v1322_v51 = vsel %vm2822_vm12, %v1319_v31, 0.0  ;;  %vm3701_vm12 = vmmov %vm3696_vm2  ;;  %v3735_v31 = vld [vmem:[#allocation3_spill] sm:$0xff] }
 0x443   :  { %2513 = vmatpush.msk.msra.mxu1 %vm127_vm3, %v1322_v51  ;;  %vm3704_vm2 = vmmov %vm3699_vm0 }
 0x444   :  { %2514 = vmatmul.msk.f32.vlgmr.msra.gmra.mxu1 %vm3698_vm5, %v1325_v14  ;;  %vm3706_vm5 = vnez %v3590_v16 }
 0x448   :  { %v1314_v43 = vpop.permute.xlu0 %1313 }
 0x449   :  { %v1318_v21 = vsel %vm3699_vm0, %v1312_v25, %v1314_v43  ;;  %v1529_v32 = vpop.permute.xlu1 %1528  ;;  %vm3707_vm0 = vnez %v3592_v18  ;;  %v2519_v18 = vld [vmem:[%s3527_s2 + $0x8] sm:$0xf] }
 0x44a   :  { %v1323_v47 = vsel %vm3700_vm8, %v1318_v21, 0.0  ;;  %v1533_v3 = vsel %vm3702_vm6, %v1529_v32, %v1523_v28  ;;  %vm3708_vm8 = vmmov %vm3701_vm12 }
 0x44b   :  { %2515 = vmatpush.msk.msra.mxu2 %vm127_vm3, %v1323_v47  ;;  %v1537_v55 = vsel %vm3707_vm0, %v1533_v3, 0.0  ;;  %vm3710_vm6 = vmmov %vm3704_vm2 }
 0x44c   :  { %2516 = vmatmul.msk.f32.vlgmr.msra.gmra.mxu2 %vm3701_vm12, %v1325_v14  ;;  %vm3709_vm12 = vmmov %vm3708_vm8 }
 0x450   :  { %v1316_v63 = vpop.permute.xlu0 %1315 }
 0x451   :  { %v1317_v40 = vsel %vm3703_vm9, %v1314_v43, %v1316_v63  ;;  %v1320_v53 = vsel %vm3704_vm2, %v1316_v63, %v1310_v48  ;;  %v1642_v41 = vpop.permute.xlu1 %1641  ;;  %vm3711_vm9 = vcmp.lt.s32.totalorder %v2678_v23, 127  ;;  %vm3712_vm2 = vnez %v3598_v29  ;;  %v3740_v43 = vld [vmem:[#allocation6_spill] sm:$0xff] }
 0x452   :  { %v1321_v59 = vsel %vm3705_vm10, %v1320_v53, 0.0  ;;  %v1324_v52 = vsel %vm3706_vm5, %v1317_v40, 0.0  ;;  %v1648_v15 = vsel %vm3710_vm6, %v1642_v41, %v1644_v50  ;;  %vm3713_vm10 = vnez %v3573_v58  ;;  %vm3714_vm5 = vmmov %vm3708_vm8  ;;  %v3744_v40 = vld [vmem:[#allocation7_spill] sm:$0xff] }
 0x453   :  { %2511 = vmatpush.msk.msra.mxu0 %vm127_vm3, %v1321_v59  ;;  %2517 = vmatpush.msk.msra.mxu3 %vm127_vm3, %v1324_v52  ;;  %v1653_v54 = vsel %vm3713_vm10, %v1648_v15, 0.0  ;;  %vm3715_vm0 = vmmov %vm3714_vm5 }
 0x454   :  { %2512 = vmatmul.msk.f32.vlgmr.msra.gmra.mxu0 %vm3708_vm8, %v1325_v14  ;;  %2518 = vmatmul.msk.f32.vlgmr.msra.gmra.mxu3 %vm3709_vm12, %v1325_v14  ;;  %vm3716_vm8 = vmmov %vm3710_vm6 }
 0x455   :  { %2526 = vmatpush.msk.msrb.mxu3 %vm127_vm3, %v1537_v55  ;;  %vm3717_vm12 = vmmov %vm3711_vm9 }
 0x456   :  { %vm3718_vm6 = vmmov %vm3711_vm9 }
 0x457   :  { %vm3721_vm10 = vmmov %vm3715_vm0 }
 0x458   :  { %v1527_v60 = vpop.permute.xlu0 %1526 }
 0x459   :  { %v1530_v16 = vsel %vm3711_vm9, %v1527_v60, %v1529_v32  ;;  %v1640_v62 = vpop.permute.xlu1 %1639  ;;  %vm3719_vm9 = vnez %v3610_v44  ;;  %v1860_v44 = vpop.permute.xlu2 %1859 }
 0x45a   :  { %v1536_v10 = vsel %vm3712_vm2, %v1530_v16, 0.0  ;;  %v1649_v29 = vsel %vm3716_vm8, %v1640_v62, %v1642_v41  ;;  %vm3720_vm2 = vnez %v3613_v45  ;;  %v1866_v22 = vsel %vm3718_vm6, %v1860_v44, %v1862_v49 }
 0x45b   :  { %2524 = vmatpush.msk.msrb.mxu2 %vm127_vm3, %v1536_v10  ;;  %v1652_v7 = vsel %vm2812_vm11, %v1649_v29, 0.0  ;;  %vm3724_vm11 = vnez %v3583_v9  ;;  %v1870_v9 = vsel %vm2917_vm4, %v1866_v22, 0.0  ;;  %v3765_v29 = vld [vmem:[#allocation11_spill] sm:$0xff]  ;;  %v1404_v23 = vpop.f32.mrf.mxu2 }
 0x45c   :  { %2525 = vmatmul.msk.f32.vlgmr.msrb.gmra.mxu2 %vm3714_vm5, %v2519_v18  ;;  %2527 = vmatmul.msk.f32.vlgmr.msrb.gmra.mxu3 %vm3715_vm0, %v2519_v18  ;;  %vm3722_vm5 = vmmov %vm3715_vm0 }
 0x45d   :  { %2533 = vmatpush.msk.msra.mxu2 %vm127_vm3, %v1653_v54 }
 0x45f   :  { %2542 = vmatpush.msk.msrb.mxu2 %vm127_vm3, %v3206_v2  ;;  %v2528_v2 = vld [vmem:[%s3527_s2 + $0xc] sm:$0xf] }
 0x460   :  { %v1525_v42 = vpop.permute.xlu0 %1524 }
 0x461   :  { %v1531_v4 = vsel %vm3717_vm12, %v1525_v42, %v1527_v60  ;;  %v1532_v58 = vsel %vm3718_vm6, %v1523_v28, %v1525_v42  ;;  %v1858_v13 = vpop.permute.xlu1 %1857  ;;  %vm3723_vm12 = vmmov %vm3716_vm8  ;;  %v1993_v26 = vpop.permute.xlu2 %1992  ;;  %v2546_v28 = vld [vmem:[%s3527_s2 + $0x14] sm:$0xf] }
 0x462   :  { %v1534_v5 = vsel %vm3719_vm9, %v1532_v58, 0.0  ;;  %v1535_v6 = vsel %vm3720_vm2, %v1531_v4, 0.0  ;;  %vm3725_vm9 = vmmov %vm3718_vm6 }
 0x463   :  { %2520 = vmatpush.msk.msrb.mxu0 %vm127_vm3, %v1534_v5  ;;  %2522 = vmatpush.msk.msrb.mxu1 %vm127_vm3, %v1535_v6  ;;  %v1867_v12 = vsel %vm3725_vm9, %v1858_v13, %v1860_v44  ;;  %vm3726_vm2 = vmmov %vm3715_vm0  ;;  %v3771_v5 = vld [vmem:[#allocation13_spill] sm:$0xff]  ;;  %v1424_v44 = vpop.f32.mrf.mxu3 }
 0x464   :  { %2521 = vmatmul.msk.f32.vlgmr.msrb.gmra.mxu0 %vm3721_vm10, %v2519_v18  ;;  %2523 = vmatmul.msk.f32.vlgmr.msrb.gmra.mxu1 %vm3722_vm5, %v2519_v18  ;;  %vm3728_vm10 = vmmov %vm3715_vm0  ;;  %v1869_v11 = vsel %vm2911_vm1, %v1867_v12, 0.0  ;;  %vm3736_vm1 = vnez %v3735_v31 }
 0x465   :  { %2531 = vmatpush.msk.msra.mxu1 %vm127_vm3, %v1652_v7  ;;  %2534 = vmatmul.msk.f32.vlgmr.msra.gmra.mxu2 %vm3715_vm0, %v2528_v2  ;;  %vm3731_vm5 = vmmov %vm3715_vm0 }
 0x466   :  { %vm3734_vm4 = vmmov %vm3723_vm12 }
 0x467   :  { %2540 = vmatpush.msk.msrb.mxu1 %vm127_vm3, %v3199_v0  ;;  %v2537_v0 = vld [vmem:[%s3527_s2 + $0x10] sm:$0xf]  ;;  %vm3742_vm9 = vmmov %vm3726_vm2 }
 0x468   :  { %v1646_v45 = vpop.permute.xlu0 %1645 }
 0x469   :  { %v1647_v17 = vsel %vm3716_vm8, %v1644_v50, %v1646_v45  ;;  %v1650_v1 = vsel %vm3723_vm12, %v1646_v45, %v1640_v62  ;;  %v1991_v24 = vpop.permute.xlu1 %1990  ;;  %vm3738_vm12 = vmmov %vm3726_vm2  ;;  %v2215_v63 = vpop.permute.xlu2 %2214  ;;  %v2555_v50 = vld [vmem:[%s3527_s2 + $0x18] sm:$0xf]  ;;  %v3757_v62 = vld [vmem:[#allocation10_spill] sm:$0xff] }
 0x46a   :  { %v1651_v19 = vsel %vm2831_vm13, %v1650_v1, 0.0  ;;  %v1654_v20 = vsel %vm3724_vm11, %v1647_v17, 0.0  ;;  %vm3727_vm13 = vmmov %vm3715_vm0  ;;  %v1994_v25 = vsel %vm3734_vm4, %v1991_v24, %v1993_v26 }
 0x46b   :  { %2529 = vmatpush.msk.msra.mxu0 %vm127_vm3, %v1651_v19  ;;  %2535 = vmatpush.msk.msra.mxu3 %vm127_vm3, %v1654_v20  ;;  %vm3732_vm0 = vmmov %vm3718_vm6  ;;  %vm3741_vm6 = vnez %v3740_v43 }
 0x46c   :  { %2530 = vmatmul.msk.f32.vlgmr.msra.gmra.mxu0 %vm3726_vm2, %v2528_v2  ;;  %2532 = vmatmul.msk.f32.vlgmr.msra.gmra.mxu1 %vm3727_vm13, %v2528_v2  ;;  %vm3733_vm8 = vmmov %vm3732_vm0  ;;  %v2001_v21 = vsel %vm3741_vm6, %v1994_v25, 0.0  ;;  %vm3745_vm13 = vnez %v3744_v40  ;;  %v1384_v7 = vpop.f32.mrf.mxu1 }
 0x46d   :  { %2536 = vmatmul.msk.f32.vlgmr.msra.gmra.mxu3 %vm3728_vm10, %v2528_v2  ;;  %2538 = vmatpush.msk.msrb.mxu0 %vm127_vm3, %v3190_v56  ;;  %vm3739_vm11 = vmmov %vm3726_vm2  ;;  %v1364_v2 = vpop.f32.mrf.mxu0 }
 0x46e   :  { %2543 = vmatmul.msk.f32.vlgmr.msrb.gmra.mxu2 %vm3731_vm5, %v2537_v0  ;;  %2544 = vmatpush.msk.msrb.mxu3 %vm127_vm3, %v3192_v57  ;;  %vm3746_vm10 = vmmov %vm3732_vm0  ;;  %vm3747_vm5 = vcmp.lt.s32.totalorder %v2699_v36, 15 }
 0x46f   :  { %2549 = vmatpush.msk.msra.mxu1 %vm127_vm3, %v1870_v9  ;;  %2547 = vmatpush.msk.msra.mxu0 %vm127_vm3, %v1869_v11  ;;  %v2105_v59 = vsel %vm3747_vm5, %v3266_v38, 0.0  ;;  %vm3766_vm5 = vnez %v3765_v29 }
 0x470   :  { %v1864_v46 = vpop.permute.xlu0 %1863 }
 0x471   :  { %v1865_v56 = vsel %vm3732_vm0, %v1862_v49, %v1864_v46  ;;  %v1868_v48 = vsel %vm3733_vm8, %v1864_v46, %v1858_v13  ;;  %v2213_v32 = vpop.permute.xlu1 %2212  ;;  %vm3748_vm0 = vmmov %vm3726_vm2  ;;  %v2564_v49 = vld [vmem:[%s3527_s2 + $0x1c] sm:$0xf]  ;;  %v2573_v13 = vld [vmem:[%s3527_s2 + $0x20] sm:$0xf] }
 0x472   :  { %v1871_v51 = vsel %vm3736_vm1, %v1865_v56, 0.0  ;;  %v1872_v57 = vsel %vm2840_vm15, %v1868_v48, 0.0  ;;  %vm3743_vm15 = vmmov %vm3734_vm4  ;;  %v2216_v41 = vsel %vm3746_vm10, %v2213_v32, %v2215_v63  ;;  %vm3750_vm4 = vcmp.lt.s32.totalorder %v2695_v34, 15 }
 0x473   :  { %2551 = vmatpush.msk.msra.mxu2 %vm127_vm3, %v1871_v51  ;;  %2553 = vmatpush.msk.msra.mxu3 %vm127_vm3, %v1872_v57  ;;  %vm3749_vm8 = vmmov %vm3748_vm0  ;;  %v2106_v52 = vsel %vm3750_vm4, %v3255_v30, 0.0  ;;  %v2222_v60 = vsel %vm3045_vm14, %v2216_v41, 0.0 }
 0x474   :  { %2539 = vmatmul.msk.f32.vlgmr.msrb.gmra.mxu0 %vm3738_vm12, %v2537_v0  ;;  %2541 = vmatmul.msk.f32.vlgmr.msrb.gmra.mxu1 %vm3739_vm11, %v2537_v0  ;;  %vm3751_vm1 = vmmov %vm3748_vm0 }
 0x475   :  { %2545 = vmatmul.msk.f32.vlgmr.msrb.gmra.mxu3 %vm3742_vm9, %v2537_v0  ;;  %vm3753_vm12 = vmmov %vm3748_vm0  ;;  %vm3758_vm9 = vnez %v3757_v62 }
 0x476   :  { %2552 = vmatmul.msk.f32.vlgmr.msra.gmra.mxu2 %vm3726_vm2, %v2546_v28  ;;  %2562 = vmatpush.msk.msrb.mxu3 %vm127_vm3, %v2001_v21  ;;  %vm3754_vm11 = vmmov %vm3743_vm15  ;;  %vm3760_vm2 = vcmp.lt.s32.totalorder %v2693_v33, 15 }
 0x477   :  { %vm3755_vm6 = vmmov %vm3754_vm11  ;;  %v2103_v54 = vsel %vm3760_vm2, %v3286_v39, 0.0 }
 0x478   :  { %v1989_v47 = vpop.permute.xlu0 %1988  ;;  %vm3759_vm14 = vmmov %vm3746_vm10 }
 0x479   :  { %v1995_v3 = vsel %vm3743_vm15, %v1989_v47, %v1991_v24  ;;  %v2211_v36 = vpop.permute.xlu1 %2210  ;;  %vm3761_vm15 = vmmov %vm3748_vm0 }
 0x47a   :  { %v2000_v53 = vsel %vm3745_vm13, %v1995_v3, 0.0  ;;  %v2217_v10 = vsel %vm3759_vm14, %v2211_v36, %v2213_v32  ;;  %vm3763_vm13 = vcmp.lt.s32.totalorder %v2697_v35, 15  ;;  %vm3764_vm10 = vmmov %vm3748_vm0 }
 0x47b   :  { %2560 = vmatpush.msk.msrb.mxu2 %vm127_vm3, %v2000_v53  ;;  %v2104_v42 = vsel %vm3763_vm13, %v3278_v37, 0.0  ;;  %v2221_v4 = vsel %vm3766_vm5, %v2217_v10, 0.0  ;;  %v3769_v37 = vld [vmem:[#allocation12_spill] sm:$0xff]  ;;  %vm3777_vm2 = vmmov %vm3748_vm0 }
 0x47c   :  { %2548 = vmatmul.msk.f32.vlgmr.msra.gmra.mxu0 %vm3748_vm0, %v2546_v28  ;;  %2550 = vmatmul.msk.f32.vlgmr.msra.gmra.mxu1 %vm3749_vm8, %v2546_v28  ;;  %vm3767_vm8 = vmmov %vm3759_vm14 }
 0x47d   :  { %2554 = vmatmul.msk.f32.vlgmr.msra.gmra.mxu3 %vm3751_vm1, %v2546_v28  ;;  %2569 = vmatpush.msk.msra.mxu2 %vm127_vm3, %v2105_v59  ;;  %vm3768_vm4 = vmmov %vm3767_vm8  ;;  %vm3770_vm1 = vnez %v3769_v37 }
 0x47e   :  { %2561 = vmatmul.msk.f32.vlgmr.msrb.gmra.mxu2 %vm3753_vm12, %v2555_v50  ;;  %2571 = vmatpush.msk.msra.mxu3 %vm127_vm3, %v2106_v52  ;;  %vm3772_vm12 = vnez %v3771_v5  ;;  %vm3776_vm14 = vmmov %vm3748_vm0 }
 0x47f   :  { %2578 = vmatpush.msk.msrb.mxu2 %vm127_vm3, %v2222_v60 }
 0x480   :  { %v1987_v38 = vpop.permute.xlu0 %1986 }
 0x481   :  { %v1996_v15 = vsel %vm3754_vm11, %v1987_v38, %v1989_v47  ;;  %v1997_v34 = vsel %vm3755_vm6, %v1993_v26, %v1987_v38  ;;  %vm3773_vm11 = vmmov %vm3748_vm0 }
 0x482   :  { %v1998_v16 = vsel %vm3072_vm7, %v1997_v34, 0.0  ;;  %v1999_v18 = vsel %vm3758_vm9, %v1996_v15, 0.0  ;;  %vm3762_vm7 = vmmov %vm3748_vm0 }
 0x483   :  { %2556 = vmatpush.msk.msrb.mxu0 %vm127_vm3, %v1998_v16  ;;  %2558 = vmatpush.msk.msrb.mxu1 %vm127_vm3, %v1999_v18  ;;  %vm3774_vm6 = vmmov %vm3748_vm0 }
 0x484   :  { %2557 = vmatmul.msk.f32.vlgmr.msrb.gmra.mxu0 %vm3761_vm15, %v2555_v50  ;;  %2559 = vmatmul.msk.f32.vlgmr.msrb.gmra.mxu1 %vm3762_vm7, %v2555_v50  ;;  %vm3775_vm9 = vmmov %vm3748_vm0 }
 0x485   :  { %2563 = vmatmul.msk.f32.vlgmr.msrb.gmra.mxu3 %vm3764_vm10, %v2555_v50  ;;  %2565 = vmatpush.msk.msra.mxu0 %vm127_vm3, %v2103_v54  ;;  %vm3778_vm15 = vmmov %vm3748_vm0 }
 0x486   :  { %2567 = vmatpush.msk.msra.mxu1 %vm127_vm3, %v2104_v42  ;;  %2570 = vmatmul.msk.f32.vlgmr.msra.gmra.mxu2 %vm3748_vm0, %v2564_v49  ;;  %vm3779_vm7 = vmmov %vm3748_vm0 }
 0x488   :  { %2576 = vmatpush.msk.msrb.mxu1 %vm127_vm3, %v2221_v4  ;;  %v2209_v33 = vpop.permute.xlu0 %2208 }
 0x489   :  { %v2218_v39 = vsel %vm3767_vm8, %v2209_v33, %v2211_v36  ;;  %v2219_v35 = vsel %vm3768_vm4, %v2215_v63, %v2209_v33 }
 0x48a   :  { %v2220_v58 = vsel %vm3770_vm1, %v2218_v39, 0.0  ;;  %v2223_v6 = vsel %vm3772_vm12, %v2219_v35, 0.0 }
 0x48b   :  { %2574 = vmatpush.msk.msrb.mxu0 %vm127_vm3, %v2220_v58  ;;  %2580 = vmatpush.msk.msrb.mxu3 %vm127_vm3, %v2223_v6 }
 0x48c   :  { %2566 = vmatmul.msk.f32.vlgmr.msra.gmra.mxu0 %vm3773_vm11, %v2564_v49  ;;  %2568 = vmatmul.msk.f32.vlgmr.msra.gmra.mxu1 %vm3774_vm6, %v2564_v49 }
 0x48d   :  { %2572 = vmatmul.msk.f32.vlgmr.msra.gmra.mxu3 %vm3775_vm9, %v2564_v49 }
 0x48e   :  { %2579 = vmatmul.msk.f32.vlgmr.msrb.gmra.mxu2 %vm3776_vm14, %v2573_v13 }
 0x494   :  { %2575 = vmatmul.msk.f32.vlgmr.msrb.gmra.mxu0 %vm3777_vm2, %v2573_v13  ;;  %2577 = vmatmul.msk.f32.vlgmr.msrb.gmra.mxu1 %vm3778_vm15, %v2573_v13 }
 0x495   :  { %2581 = vmatmul.msk.f32.vlgmr.msrb.gmra.mxu3 %vm3779_vm7, %v2573_v13 }
 0x4c1   :  { %v1479_v1 = vpop.f32.mrf.mxu1 }
 0x4c2   :  { %v1480_v21 = vadd.f32 %v1479_v1, %v1384_v7 }
 0x4cf   :  { %v1499_v45 = vpop.f32.mrf.mxu2 }
 0x4d0   :  { %v1500_v47 = vadd.f32 %v1499_v45, %v1404_v23 }
 0x4d1   :  { %v1459_v17 = vpop.f32.mrf.mxu0 }
 0x4d2   :  { %v1460_v43 = vadd.f32 %v1459_v17, %v1364_v2 }
 0x4d7   :  { %v1519_v19 = vpop.f32.mrf.mxu3 }
 0x4d8   :  { %v1520_v60 = vadd.f32 %v1519_v19, %v1424_v44 }
 0x4df   :  { %v1612_v20 = vpop.f32.mrf.mxu2  ;;  %v1632_v0 = vpop.f32.mrf.mxu3 }
 0x4e0   :  { %v1637_v53 = vadd.f32 %v1612_v20, %v1500_v47  ;;  %v1638_v34 = vadd.f32 %v1632_v0, %v1520_v60 }
 0x4e1   :  { %v1572_v22 = vpop.f32.mrf.mxu0  ;;  %v1592_v12 = vpop.f32.mrf.mxu1 }
 0x4e2   :  { %v1635_v32 = vadd.f32 %v1572_v22, %v1460_v43  ;;  %v1636_v3 = vadd.f32 %v1592_v12, %v1480_v21 }
 0x4e8   :  { %v1729_v24 = vpop.f32.mrf.mxu2 }
 0x4e9   :  { %v1689_v8 = vpop.f32.mrf.mxu0  ;;  %v1709_v9 = vpop.f32.mrf.mxu1  ;;  %v1754_v36 = vadd.f32 %v1729_v24, %v1637_v53 }
 0x4ea   :  { %v1752_v63 = vadd.f32 %v1689_v8, %v1635_v32  ;;  %v1753_v41 = vadd.f32 %v1709_v9, %v1636_v3 }
 0x4f0   :  { %v1749_v27 = vpop.f32.mrf.mxu3 }
 0x4f1   :  { %v1830_v11 = vpop.f32.mrf.mxu2  ;;  %v1790_v26 = vpop.f32.mrf.mxu0  ;;  %v1755_v18 = vadd.f32 %v1749_v27, %v1638_v34 }
 0x4f2   :  { %v1810_v46 = vpop.f32.mrf.mxu1  ;;  %v1853_v52 = vadd.f32 %v1790_v26, %v1752_v63  ;;  %v1855_v30 = vadd.f32 %v1830_v11, %v1754_v36 }
 0x4f3   :  { %v1854_v38 = vadd.f32 %v1810_v46, %v1753_v41 }
 0x4f8   :  { %v1850_v56 = vpop.f32.mrf.mxu3 }
 0x4f9   :  { %v1947_v48 = vpop.f32.mrf.mxu2  ;;  %v1907_v25 = vpop.f32.mrf.mxu0  ;;  %v1856_v29 = vadd.f32 %v1850_v56, %v1755_v18  ;;  %v2392_v18 = vld.sshfl [vmem:[#allocation1 + $0x10] sm:$0xff pattern:$0x75316420] }
 0x4fa   :  { %v1927_v31 = vpop.f32.mrf.mxu1  ;;  %v1970_v15 = vadd.f32 %v1907_v25, %v1853_v52  ;;  %v1972_v10 = vadd.f32 %v1947_v48, %v1855_v30 }
 0x4fb   :  { %v1971_v16 = vadd.f32 %v1927_v31, %v1854_v38 }
 0x500   :  { %v1967_v51 = vpop.f32.mrf.mxu3 }
 0x501   :  { %v2076_v14 = vpop.f32.mrf.mxu2  ;;  %v2036_v57 = vpop.f32.mrf.mxu0  ;;  %v1973_v5 = vadd.f32 %v1967_v51, %v1856_v29 }
 0x502   :  { %v2056_v28 = vpop.f32.mrf.mxu1  ;;  %v2099_v62 = vadd.f32 %v2036_v57, %v1970_v15  ;;  %v2101_v4 = vadd.f32 %v2076_v14, %v1972_v10  ;;  %v2393_v10 = vld.sshfl [vmem:[#allocation1 + $0x18] sm:$0xff pattern:$0x75316420] }
 0x503   :  { %v2100_v49 = vadd.f32 %v2056_v28, %v1971_v16 }
 0x508   :  { %v2096_v40 = vpop.f32.mrf.mxu3 }
 0x509   :  { %v2181_v50 = vpop.f32.mrf.mxu2  ;;  %v2141_v59 = vpop.f32.mrf.mxu0  ;;  %v2102_v2 = vadd.f32 %v2096_v40, %v1973_v5 }
 0x50a   :  { %v2161_v55 = vpop.f32.mrf.mxu1  ;;  %v2204_v54 = vadd.f32 %v2141_v59, %v2099_v62  ;;  %v2206_v6 = vadd.f32 %v2181_v50, %v2101_v4  ;;  %v2353_v59 = vld [vmem:[%s3528_s5] sm:$0xf] }
 0x50b   :  { %v2205_v33 = vadd.f32 %v2161_v55, %v2100_v49 }
 0x510   :  { %v2201_v42 = vpop.f32.mrf.mxu3 }
 0x511   :  { %v2258_v39 = vpop.f32.mrf.mxu0  ;;  %v2298_v35 = vpop.f32.mrf.mxu2  ;;  %v2207_v17 = vadd.f32 %v2201_v42, %v2102_v2  ;;  %v2391_v42 = vld.sshfl [vmem:[#allocation1 + $0x8] sm:$0xff pattern:$0x75316420] }
 0x512   :  { %v2321_v37 = vadd.f32 %v2258_v39, %v2204_v54  ;;  %v2278_v58 = vpop.f32.mrf.mxu1  ;;  %v2323_v7 = vadd.f32 %v2298_v35, %v2206_v6  ;;  %v2390_v54 = vld.sshfl [vmem:[#allocation1] sm:$0xff pattern:$0x75316420] }
 0x513   :  { %v2322_v13 = vadd.f32 %v2278_v58, %v2205_v33 }
 0x514   :  { %v2325_v23 = vsel %vm127_vm3, %v2321_v37, 0.0  ;;  %v2328_v20 = vsel %vm127_vm3, %v2323_v7, 0.0 }
 0x515   :  { %v2326_v44 = vsel %vm127_vm3, %v2322_v13, 0.0 }
 0x516   :  { %v2327_v45 = vadd.f32 %v2326_v44, %v2325_v23 }
 0x518   :  { %v2318_v1 = vpop.f32.mrf.mxu3  ;;  %v2329_v22 = vadd.f32 %v2328_v20, %v2327_v45 }
 0x519   :  { %v2324_v19 = vadd.f32 %v2318_v1, %v2207_v17 }
 0x51b   :  { %v2330_v12 = vsel %vm127_vm3, %v2324_v19, 0.0 }
 0x51c   :  { %v2331_v0 = vadd.f32 %v2330_v12, %v2329_v22 }
 0x51e   :  { %2332 = vadd.xlane.f32.xlu2 %v2331_v0 }
 0x591   :  { %v2333_v24 = vpop.xlane.xlu2 %2332 }
 0x592   :  { %v2334_v8 = vmul.f32 %v2333_v24, %v3172_v61 }
 0x594   :  { %v2335_v9 = vsub.f32 %v2321_v37, %v2334_v8  ;;  %v2336_v27 = vsub.f32 %v2322_v13, %v2334_v8  ;;  %v2337_v11 = vsub.f32 %v2323_v7, %v2334_v8  ;;  %v2338_v26 = vsub.f32 %v2324_v19, %v2334_v8 }
 0x596   :  { %v2339_v46 = vmul.f32 %v2335_v9, %v2335_v9  ;;  %v2340_v56 = vmul.f32 %v2336_v27, %v2336_v27  ;;  %v2341_v48 = vmul.f32 %v2337_v11, %v2337_v11  ;;  %v2342_v25 = vmul.f32 %v2338_v26, %v2338_v26 }
 0x598   :  { %v2343_v31 = vsel %vm127_vm3, %v2339_v46, 0.0  ;;  %v2344_v51 = vsel %vm127_vm3, %v2340_v56, 0.0  ;;  %v2346_v57 = vsel %vm127_vm3, %v2341_v48, 0.0  ;;  %v2348_v43 = vsel %vm127_vm3, %v2342_v25, 0.0 }
 0x599   :  { %v2345_v14 = vadd.f32 %v2344_v51, %v2343_v31 }
 0x59b   :  { %v2347_v28 = vadd.f32 %v2346_v57, %v2345_v14 }
 0x59d   :  { %v2349_v21 = vadd.f32 %v2348_v43, %v2347_v28 }
 0x59f   :  { %2350 = vadd.xlane.f32.xlu0 %v2349_v21 }
 0x612   :  { %v2351_v32 = vpop.xlane.xlu0 %2350 }
 0x613   :  { %v2352_v47 = vmul.f32 %v2351_v32, %v3172_v61  ;;  %v2366_v61 = vld [vmem:[%s3529_s6] sm:$0xf] }
 0x615   :  { %v2354_v3 = vadd.f32 1e-05, %v2352_v47 }
 0x617   :  { %2594 = vrsqrt.f32 %v2354_v3  ;;  %vm2361_vm10 = vweird.f32 %v2354_v3 }
 0x61d   :  { %v2595_v63 = vpop.eup %2594 }
 0x61e   :  { %v2356_v40 = vmul.f32 %v2595_v63, %v2354_v3  ;;  %vm2362_vm13 = vweird.f32 %v2595_v63 }
 0x61f   :  { %vm2363_vm5 = vmor %vm2361_vm10, %vm2362_vm13 }
 0x620   :  { %v2357_v53 = vmul.f32 %v2595_v63, %v2356_v40 }
 0x622   :  { %v2358_v41 = vmul.f32 0.5, %v2357_v53 }
 0x624   :  { %v2359_v50 = vsub.f32 1.5, %v2358_v41 }
 0x626   :  { %v2360_v52 = vmul.f32 %v2595_v63, %v2359_v50 }
 0x628   :  { %v2364_v55 = vsel %vm2363_vm5, %v2595_v63, %v2360_v52 }
 0x629   :  { %v2365_v60 = vmul.f32 %v2364_v55, %v2353_v59 }
 0x62b   :  { %2371 = vperm.xlu1 %2588, %v2365_v60   ;;  %v2367_v36 = vmul.f32 %v2365_v60, %v2334_v8 }
 0x62d   :  { %v2368_v38 = vsub.f32 %v2366_v61, %v2367_v36 }
 0x633   :  { %2380 = vperm.xlu1 %2588, %v2368_v38  }
 0x69d   :  { %v2372_v15 = vpop.permute.xlu1 %2371 }
 0x69e   :  { %v2374_v34 = vmul.f32 %v2372_v15, %v2321_v37  ;;  %v2375_v30 = vmul.f32 %v2372_v15, %v2322_v13  ;;  %v2376_v16 = vmul.f32 %v2372_v15, %v2323_v7  ;;  %v2377_v62 = vmul.f32 %v2372_v15, %v2324_v19 }
 0x6a5   :  { %v2381_v49 = vpop.permute.xlu1 %2380 }
 0x6a6   :  { %v2383_v29 = vadd.f32 %v2381_v49, %v2374_v34  ;;  %v2384_v4 = vadd.f32 %v2381_v49, %v2375_v30  ;;  %v2385_v33 = vadd.f32 %v2381_v49, %v2376_v16  ;;  %v2386_v39 = vadd.f32 %v2381_v49, %v2377_v62 }
 0x6a8   :  { %v2398_v35 = vadd.f32 %v2390_v54, %v2383_v29  ;;  %v2399_v58 = vadd.f32 %v2391_v42, %v2384_v4  ;;  %v2400_v5 = vadd.f32 %v2392_v18, %v2385_v33  ;;  %v2401_v6 = vadd.f32 %v2393_v10, %v2386_v39 }
 0x6aa   :  { %v2403_v23 = vmax.f32 %v2399_v58, 0.0  ;;  %v2405_v2 = vmax.f32 %v2401_v6, 0.0  ;;  %v2402_v44 = vmax.f32 %v2398_v35, 0.0  ;;  %v2404_v37 = vmax.f32 %v2400_v5, 0.0 }
 0x6ac   :  { %v2410_v13 = vrot.slane %v2403_v23, 4  ;;  %v2411_v7 = vrot.slane %v2405_v2, 4 }
 0x6ae   :  { %v2412_v45 = vsel %vm127_vm3, %v2402_v44, %v2410_v13  ;;  %v2413_v17 = vsel %vm127_vm3, %v2404_v37, %v2411_v7 }
 0x6af   :  { %2416 = vst [vmem:[%s3530_s7] sm:$0xff] %v2412_v45 }
 0x6b0   :  { %2417 = vst [vmem:[%s3530_s7 + $0x8] sm:$0xff] %v2413_v17 }

</bundles_post_ra>
